<compile_context>
chip_gen: v5e
topology: v5e:2x2
jax: 0.10.0
libtpu: 0.0.40
codegen_flags: <defaults>
</compile_context>

<pallas_src>
import functools

import jax
import jax.numpy as jnp
from jax.experimental import pallas as pl
from jax.experimental.pallas import tpu as pltpu


IN_FEATS = 1280   # efficientnet_b0 classifier[1].in_features
HID1 = 512
HID2 = 128
LANE = 128        # pad the class dim to a multiple of this


def _head_kernel(x_ref, w1_ref, b1_ref, w2_ref, b2_ref, w3_ref, b3_ref,
                 o_ref, *, inv_s):
    # x_ref: (TB, S, C) feature-map tile. Global average pool over S with
    # f32 accumulation, scale folded in as 1/S.
    pooled = jnp.sum(x_ref[...], axis=1, dtype=jnp.float32) * inv_s   # (TB, C) f32

    # fc1 + ReLU   (bf16 operands, f32 accumulation on the MXU)
    h1 = jnp.dot(pooled.astype(jnp.bfloat16), w1_ref[...],
                 preferred_element_type=jnp.float32)
    h1 = jnp.maximum(h1 + b1_ref[...], 0.0)                            # (TB, 512)

    # fc2 + ReLU
    h2 = jnp.dot(h1.astype(jnp.bfloat16), w2_ref[...],
                 preferred_element_type=jnp.float32)
    h2 = jnp.maximum(h2 + b2_ref[...], 0.0)                            # (TB, 128)

    # fc3 (logits, padded to lane-dense width)
    y = jnp.dot(h2.astype(jnp.bfloat16), w3_ref[...],
                preferred_element_type=jnp.float32)
    o_ref[...] = (y + b3_ref[...]).astype(o_ref.dtype)                 # (TB, NC_PAD)


def _pick_batch_tile(batch):
    """Batch tile: whole batch when small, else a multiple-of-8 divisor <= 64."""
    if batch <= 64:
        return batch
    for tb in (64, 32, 16, 8):
        if batch % tb == 0:
            return tb
    return batch


def prepare_head_params(params, num_classes):
    """One-time (outside the jitted forward) weight prep:
    transpose to (in, out), cast to bf16, pad fc3 to a 128-wide lane dim."""
    w1, b1, w2, b2, w3, b3 = params
    nc_pad = ((num_classes + LANE - 1) // LANE) * LANE

    w1_t = jnp.asarray(w1.T, jnp.bfloat16)                 # (1280, 512)
    w2_t = jnp.asarray(w2.T, jnp.bfloat16)                 # (512, 128)
    w3_t = jnp.zeros((HID2, nc_pad), jnp.bfloat16)
    w3_t = w3_t.at[:, :num_classes].set(jnp.asarray(w3.T, jnp.bfloat16))

    b1_r = jnp.asarray(b1, jnp.float32).reshape(1, HID1)
    b2_r = jnp.asarray(b2, jnp.float32).reshape(1, HID2)
    b3_r = jnp.zeros((1, nc_pad), jnp.float32)
    b3_r = b3_r.at[0, :num_classes].set(jnp.asarray(b3, jnp.float32))

    return (w1_t, b1_r, w2_t, b2_r, w3_t, b3_r)


def efficientnet_b0_head(feat_nhwc, kernel_params, num_classes):
    """feat_nhwc: (B, H, W, C=1280) backbone feature map in NHWC layout.

    Returns logits of shape (B, num_classes) in float32.
    """
    w1_t, b1_r, w2_t, b2_r, w3_t, b3_r = kernel_params
    B, H, W, C = feat_nhwc.shape
    assert C == IN_FEATS
    S = H * W
    nc_pad = w3_t.shape[1]

    # Free reshape (collapses adjacent dims, no data movement).
    x = feat_nhwc.reshape(B, S, C)

    tb = _pick_batch_tile(B)
    grid = (B // tb,)

    def resident(shape):
        # Weight/bias blocks: full array, same block every grid step ->
        # DMA'd once and kept VMEM-resident.
        return pl.BlockSpec(shape, lambda b: (0,) * len(shape))

    out = pl.pallas_call(
        functools.partial(_head_kernel, inv_s=1.0 / S),
        out_shape=jax.ShapeDtypeStruct((B, nc_pad), jnp.float32),
        grid=grid,
        in_specs=[
            pl.BlockSpec((tb, S, C), lambda b: (b, 0, 0)),   # feature-map tile
            resident(w1_t.shape), resident(b1_r.shape),
            resident(w2_t.shape), resident(b2_r.shape),
            resident(w3_t.shape), resident(b3_r.shape),
        ],
        out_specs=pl.BlockSpec((tb, nc_pad), lambda b: (b, 0)),
        compiler_params=pltpu.CompilerParams(
            dimension_semantics=("parallel",)),
    )(x, w1_t, b1_r, w2_t, b2_r, w3_t, b3_r)

    return out[:, :num_classes]


def init_params(key, num_classes):
    """PyTorch-layout (out, in) float32 params for the head."""
    k1, k2, k3, k4, k5, k6 = jax.random.split(key, 6)
    scale = 0.02
    w1 = scale * jax.random.normal(k1, (HID1, IN_FEATS), jnp.float32)
    b1 = scale * jax.random.normal(k2, (HID1,), jnp.float32)
    w2 = scale * jax.random.normal(k3, (HID2, HID1), jnp.float32)
    b2 = scale * jax.random.normal(k4, (HID2,), jnp.float32)
    w3 = scale * jax.random.normal(k5, (num_classes, HID2), jnp.float32)
    b3 = scale * jax.random.normal(k6, (num_classes,), jnp.float32)
    return (w1, b1, w2, b2, w3, b3)


def reference_head(feat_nhwc, params):
    """Pure-JAX f32 reference mirroring the PyTorch forward (eval mode)."""
    w1, b1, w2, b2, w3, b3 = params
    pooled = jnp.mean(feat_nhwc, axis=(1, 2))            # avgpool + flatten
    h1 = jax.nn.relu(pooled @ w1.T + b1)
    h2 = jax.nn.relu(h1 @ w2.T + b2)
    return h2 @ w3.T + b3


if __name__ == "__main__":
    key = jax.random.PRNGKey(0)
    k_feat, k_params = jax.random.split(key)

    batch = 2
    num_classes = 8
    Hf = Wf = 4  # small spatial extent standing in for the backbone's 7x7 map

    # Deterministic synthetic backbone feature map in NHWC (stands in for
    # backbone.features(x) emitted in the TPU-natural layout).
    feat_nhwc = jax.random.normal(k_feat, (batch, Hf, Wf, IN_FEATS), jnp.float32)

    params = init_params(k_params, num_classes)
    kernel_params = prepare_head_params(params, num_classes)   # one-time prep

    fwd = jax.jit(functools.partial(efficientnet_b0_head, num_classes=num_classes))
    logits = jax.block_until_ready(fwd(feat_nhwc, kernel_params))

    ref = reference_head(feat_nhwc, params)
    assert logits.shape == (batch, num_classes)
    # bf16 weights/activations on the MXU (f32 accumulation) -> bf16-level tolerance.
    assert jnp.allclose(logits, ref, atol=1e-2, rtol=5e-2), (
        float(jnp.max(jnp.abs(logits - ref))))

    print("KERNEL_OK")
</pallas_src>

<mosaic_0001>
module attributes {stable_mosaic.version = 11 : i64} {
  func.func @_head_kernel(%arg0: i32, %arg1: memref<2x16x1280xf32, #tpu.memory_space<vmem>>, %arg2: memref<1280x512xbf16, #tpu.memory_space<vmem>>, %arg3: memref<1x512xf32, #tpu.memory_space<vmem>>, %arg4: memref<512x128xbf16, #tpu.memory_space<vmem>>, %arg5: memref<1x128xf32, #tpu.memory_space<vmem>>, %arg6: memref<128x128xbf16, #tpu.memory_space<vmem>>, %arg7: memref<1x128xf32, #tpu.memory_space<vmem>>, %arg8: memref<2x128xf32, #tpu.memory_space<vmem>>) attributes {dimension_semantics = [#tpu.dimension_semantics<parallel>], iteration_bounds = array<i64: 1>, scalar_prefetch = 0 : i64, scratch_operands = 0 : i64, tpu.core_type = #tpu.core_type<tc>, window_params = [{transform_indices = @transform_0, window_bounds = array<i64: 2, 16, 1280>}, {pipeline_mode = #tpu.pipeline_mode<synchronous>, transform_indices = @transform_1, window_bounds = array<i64: 1280, 512>}, {pipeline_mode = #tpu.pipeline_mode<synchronous>, transform_indices = @transform_2, window_bounds = array<i64: 1, 512>}, {pipeline_mode = #tpu.pipeline_mode<synchronous>, transform_indices = @transform_3, window_bounds = array<i64: 512, 128>}, {pipeline_mode = #tpu.pipeline_mode<synchronous>, transform_indices = @transform_4, window_bounds = array<i64: 1, 128>}, {pipeline_mode = #tpu.pipeline_mode<synchronous>, transform_indices = @transform_5, window_bounds = array<i64: 128, 128>}, {pipeline_mode = #tpu.pipeline_mode<synchronous>, transform_indices = @transform_6, window_bounds = array<i64: 1, 128>}, {transform_indices = @transform_7, window_bounds = array<i64: 2, 128>}]} {
    %c0 = arith.constant 0 : index
    %c0_0 = arith.constant 0 : index
    %c0_1 = arith.constant 0 : index
    %0 = vector.load %arg1[%c0, %c0_0, %c0_1] : memref<2x16x1280xf32, #tpu.memory_space<vmem>>, vector<2x16x1280xf32>
    %cst = arith.constant dense<0.000000e+00> : vector<2x1280xf32>
    %1 = vector.multi_reduction <add>, %0, %cst [1] : vector<2x16x1280xf32> to vector<2x1280xf32>
    %cst_2 = arith.constant 6.250000e-02 : f32
    %2 = vector.broadcast %cst_2 : f32 to vector<2x1280xf32>
    %3 = arith.mulf %1, %2 : vector<2x1280xf32>
    %4 = arith.truncf %3 : vector<2x1280xf32> to vector<2x1280xbf16>
    %c0_3 = arith.constant 0 : index
    %c0_4 = arith.constant 0 : index
    %5 = vector.load %arg2[%c0_3, %c0_4] : memref<1280x512xbf16, #tpu.memory_space<vmem>>, vector<1280x512xbf16>
    %cst_5 = arith.constant dense<0.000000e+00> : vector<2x512xf32>
    %6 = tpu.matmul %4, %5, %cst_5 {dimension_numbers = #tpu.dot_dimension_numbers<[1], [0], [0], [1], [0, 0, 1, 1], [], []>} : vector<2x1280xbf16>, vector<1280x512xbf16>, vector<2x512xf32> -> vector<2x512xf32>
    %c0_6 = arith.constant 0 : index
    %c0_7 = arith.constant 0 : index
    %7 = vector.load %arg3[%c0_6, %c0_7] : memref<1x512xf32, #tpu.memory_space<vmem>>, vector<1x512xf32>
    %8 = vector.broadcast %7 : vector<1x512xf32> to vector<2x512xf32>
    %9 = arith.addf %6, %8 : vector<2x512xf32>
    %cst_8 = arith.constant 0.000000e+00 : f32
    %10 = vector.broadcast %cst_8 : f32 to vector<2x512xf32>
    %11 = arith.maximumf %9, %10 : vector<2x512xf32>
    %12 = arith.truncf %11 : vector<2x512xf32> to vector<2x512xbf16>
    %c0_9 = arith.constant 0 : index
    %c0_10 = arith.constant 0 : index
    %13 = vector.load %arg4[%c0_9, %c0_10] : memref<512x128xbf16, #tpu.memory_space<vmem>>, vector<512x128xbf16>
    %cst_11 = arith.constant dense<0.000000e+00> : vector<2x128xf32>
    %14 = tpu.matmul %12, %13, %cst_11 {dimension_numbers = #tpu.dot_dimension_numbers<[1], [0], [0], [1], [0, 0, 1, 1], [], []>} : vector<2x512xbf16>, vector<512x128xbf16>, vector<2x128xf32> -> vector<2x128xf32>
    %c0_12 = arith.constant 0 : index
    %c0_13 = arith.constant 0 : index
    %15 = vector.load %arg5[%c0_12, %c0_13] : memref<1x128xf32, #tpu.memory_space<vmem>>, vector<1x128xf32>
    %16 = vector.broadcast %15 : vector<1x128xf32> to vector<2x128xf32>
    %17 = arith.addf %14, %16 : vector<2x128xf32>
    %cst_14 = arith.constant 0.000000e+00 : f32
    %18 = vector.broadcast %cst_14 : f32 to vector<2x128xf32>
    %19 = arith.maximumf %17, %18 : vector<2x128xf32>
    %20 = arith.truncf %19 : vector<2x128xf32> to vector<2x128xbf16>
    %c0_15 = arith.constant 0 : index
    %c0_16 = arith.constant 0 : index
    %21 = vector.load %arg6[%c0_15, %c0_16] : memref<128x128xbf16, #tpu.memory_space<vmem>>, vector<128x128xbf16>
    %cst_17 = arith.constant dense<0.000000e+00> : vector<2x128xf32>
    %22 = tpu.matmul %20, %21, %cst_17 {dimension_numbers = #tpu.dot_dimension_numbers<[1], [0], [0], [1], [0, 0, 1, 1], [], []>} : vector<2x128xbf16>, vector<128x128xbf16>, vector<2x128xf32> -> vector<2x128xf32>
    %c0_18 = arith.constant 0 : index
    %c0_19 = arith.constant 0 : index
    %23 = vector.load %arg7[%c0_18, %c0_19] : memref<1x128xf32, #tpu.memory_space<vmem>>, vector<1x128xf32>
    %24 = vector.broadcast %23 : vector<1x128xf32> to vector<2x128xf32>
    %25 = arith.addf %22, %24 : vector<2x128xf32>
    %c0_20 = arith.constant 0 : index
    %c0_21 = arith.constant 0 : index
    %26 = vector.load %arg8[%c0_20, %c0_21] : memref<2x128xf32, #tpu.memory_space<vmem>>, vector<2x128xf32>
    tpu.vector_store %arg8[%c0_20, %c0_21], %25 {strides = array<i32>} : memref<2x128xf32, #tpu.memory_space<vmem>>, vector<2x128xf32>,
    return
  }
  func.func @transform_0(%arg0: i32) -> (i32, i32, i32) {
    %c0_i32 = arith.constant 0 : i32
    %c0_i32_0 = arith.constant 0 : i32
    %c0_i32_1 = arith.constant 0 : i32
    return %arg0, %c0_i32, %c0_i32_0 : i32, i32, i32
  }
  func.func @transform_1(%arg0: i32) -> (i32, i32) {
    %c0_i32 = arith.constant 0 : i32
    %c0_i32_0 = arith.constant 0 : i32
    %c0_i32_1 = arith.constant 0 : i32
    return %c0_i32, %c0_i32_0 : i32, i32
  }
  func.func @transform_2(%arg0: i32) -> (i32, i32) {
    %c0_i32 = arith.constant 0 : i32
    %c0_i32_0 = arith.constant 0 : i32
    %c0_i32_1 = arith.constant 0 : i32
    return %c0_i32, %c0_i32_0 : i32, i32
  }
  func.func @transform_3(%arg0: i32) -> (i32, i32) {
    %c0_i32 = arith.constant 0 : i32
    %c0_i32_0 = arith.constant 0 : i32
    %c0_i32_1 = arith.constant 0 : i32
    return %c0_i32, %c0_i32_0 : i32, i32
  }
  func.func @transform_4(%arg0: i32) -> (i32, i32) {
    %c0_i32 = arith.constant 0 : i32
    %c0_i32_0 = arith.constant 0 : i32
    %c0_i32_1 = arith.constant 0 : i32
    return %c0_i32, %c0_i32_0 : i32, i32
  }
  func.func @transform_5(%arg0: i32) -> (i32, i32) {
    %c0_i32 = arith.constant 0 : i32
    %c0_i32_0 = arith.constant 0 : i32
    %c0_i32_1 = arith.constant 0 : i32
    return %c0_i32, %c0_i32_0 : i32, i32
  }
  func.func @transform_6(%arg0: i32) -> (i32, i32) {
    %c0_i32 = arith.constant 0 : i32
    %c0_i32_0 = arith.constant 0 : i32
    %c0_i32_1 = arith.constant 0 : i32
    return %c0_i32, %c0_i32_0 : i32, i32
  }
  func.func @transform_7(%arg0: i32) -> (i32, i32) {
    %c0_i32 = arith.constant 0 : i32
    %c0_i32_0 = arith.constant 0 : i32
    return %arg0, %c0_i32 : i32, i32
  }
}

</mosaic_0001>

<bundles_post_ra>
// kernel: efficientnet_b0_head.1
= control target key start
LH: loop header
LB: loop body
LE: loop exit
PB: predicated region body
PF: predicated region fallthrough
CT: control target
= control target key end

     0   :  { %12 = vsyncpa [#allocation3], 0  ;;  %s5799_s0 = inlined_call_operand.vmem [shape: f32[2,16,1280], index: 0, kind: input, shape index: {}]   ;;  %s5800_s1 = inlined_call_operand.hbm [shape: bf16[1280,512], index: 1, kind: input, shape index: {}]   ;;  %s5801_s2 = inlined_call_operand.hbm [shape: f32[1,512], index: 2, kind: input, shape index: {}]   ;;  %s5802_s3 = inlined_call_operand.hbm [shape: bf16[512,128], index: 3, kind: input, shape index: {}]   ;;  %s5803_s4 = inlined_call_operand.hbm [shape: f32[1,128], index: 4, kind: input, shape index: {}]   ;;  %s5804_s5 = inlined_call_operand.hbm [shape: bf16[128,128], index: 5, kind: input, shape index: {}]   ;;  %s5805_s6 = inlined_call_operand.hbm [shape: f32[1,128], index: 6, kind: input, shape index: {}]   ;;  %s5806_s7 = inlined_call_operand.hbm [shape: f32[2,128], index: 7, kind: output, shape index: {}]  }
   0x1   :  { %13 = vsyncpa [#allocation6], 0 }
   0x2   :  { %14 = vsyncpa [#allocation9], 0 }
   0x3   :  { %15 = vsyncpa [#allocation12], 0  ;;  %s37_s26 = sshll.u32 %s5801_s2, 4  ;;  %s38_s26 = int_to_ptr.hbm [resolvable:$true] %s37_s26 }
   0x4   :  { %16 = vsyncpa [#allocation4], 0  ;;  %s5272_s27 = smov [#allocation5]   ;;  %s61_s8 = sshll.u32 %s5803_s4, 4  ;;  %s62_s8 = int_to_ptr.hbm [resolvable:$true] %s61_s8 }
   0x5   :  { %s39_s28 = sshll.u32 %s5272_s27, 4  ;;  %s5273_s9 = smov [#allocation8]   ;;  %s40_s28 = int_to_ptr.vmem [resolvable:$true] %s39_s28 }
   0x6   :  { %42 = dma.hbm_to_vmem [thread:$0]  %s38_s26, 64, %s40_s28, [#allocation6]  }
   0x7   :  { %s63_s10 = sshll.u32 %s5273_s9, 4  ;;  %s23_s13 = sshll.u32 %s5800_s1, 4  ;;  %s64_s10 = int_to_ptr.vmem [resolvable:$true] %s63_s10  ;;  %s24_s13 = int_to_ptr.hbm [resolvable:$true] %s23_s13 }
   0x8   :  { %66 = dma.hbm_to_vmem [thread:$0]  %s62_s8, 16, %s64_s10, [#allocation9]  }
   0x9   :  { %s5274_s2 = smov [#allocation2]   ;;  %s47_s17 = sshll.u32 %s5802_s3, 4  ;;  %s48_s17 = int_to_ptr.hbm [resolvable:$true] %s47_s17 }
   0xa   :  { %s25_s14 = sshll.u32 %s5274_s2, 4  ;;  %s5275_s18 = smov 256   ;;  %s26_s14 = int_to_ptr.vmem [resolvable:$true] %s25_s14 }
   0xb   :  { %s5276_s4 = smov 16   ;;  %s5277_s19 = smov [#allocation7]  }
   0xc   :  { %31 = dma.hbm_to_vmem [thread:$0]  %s24_s13, 40960, %s26_s14, [#allocation3], %s5275_s18, %s5275_s18, %s5276_s4  }
   0xd   :  { %s49_s20 = sshll.u32 %s5277_s19, 4  ;;  %s5278_s21 = smov 64   ;;  %s50_s20 = int_to_ptr.vmem [resolvable:$true] %s49_s20 }
   0xe   :  { %s5279_s22 = smov 4   ;;  %s71_s24 = sshll.u32 %s5804_s5, 4  ;;  %s72_s24 = int_to_ptr.hbm [resolvable:$true] %s71_s24 }
   0xf   :  { %55 = dma.hbm_to_vmem [thread:$0]  %s48_s17, 4096, %s50_s20, [#allocation6], %s5278_s21, %s5278_s21, %s5279_s22  }
  0x10   :  { %s5280_s25 = smov [#allocation10]   ;;  %s85_s28 = sshll.u32 %s5805_s6, 4  ;;  %s86_s28 = int_to_ptr.hbm [resolvable:$true] %s85_s28 }
  0x11   :  { %s73_s26 = sshll.u32 %s5280_s25, 4  ;;  %s5281_s29 = smov [#allocation11]   ;;  %s74_s26 = int_to_ptr.vmem [resolvable:$true] %s73_s26 }
  0x12   :  { %79 = dma.hbm_to_vmem [thread:$0]  %s72_s24, 1024, %s74_s26, [#allocation9], %s5278_s21, %s5278_s21, %s5279_s22  }
  0x13   :  { %s87_s30 = sshll.u32 %s5281_s29, 4  ;;  %s88_s30 = int_to_ptr.vmem [resolvable:$true] %s87_s30 }
  0x14   :  { %90 = dma.hbm_to_vmem [thread:$0]  %s86_s28, 16, %s88_s30, [#allocation12]  }
  0x15   :  { %5262 = dma.done.wait [#allocation3], 40960  }
  0x16   :  { %5263 = vsyncadd [#allocation3], 4294926336 }
  0x17   :  { %5264 = dma.done.wait [#allocation6], 4160  }
  0x18   :  { %5265 = vsyncadd [#allocation6], 4294963136 }
  0x19   :  { %5266 = dma.done.wait [#allocation9], 1040  }
  0x1a   :  { %5267 = vsyncadd [#allocation9], 4294966256 }
  0x1b   :  { %5268 = dma.done.wait [#allocation12], 16  }
  0x1c   :  { %5269 = vsyncadd [#allocation12], 4294967280  ;;  %v3394_v0 = vld [vmem:[#allocation2 + $0xe0] sm:$0xf]  ;;  %v4750_v1 = vld [vmem:[#allocation2 + $0xec] sm:$0xf0] }
  0x1d   :  { %v3522_v2 = vld [vmem:[#allocation2 + $0x1e0] sm:$0xf]  ;;  %v3395_v3 = vor.u32 %v4750_v1, %v3394_v0  ;;  %v4782_v4 = vld [vmem:[#allocation2 + $0x1ec] sm:$0xf0]  ;;  %vm705_vm0 = vcmask 1041409   ;;  %s3267_s3 = sshll.u32 %s5806_s7, 4  ;;  %s3268_s3 = int_to_ptr.hbm [resolvable:$true] %s3267_s3 }
  0x1e   :  { %v3650_v5 = vld [vmem:[#allocation2 + $0x2e0] sm:$0xf]  ;;  %v4814_v6 = vld [vmem:[#allocation2 + $0x2ec] sm:$0xf0]  ;;  %v3523_v7 = vor.u32 %v4782_v4, %v3522_v2 }
  0x1f   :  { %v3651_v8 = vor.u32 %v4814_v6, %v3650_v5  ;;  %v3778_v9 = vld [vmem:[#allocation2 + $0x3e0] sm:$0xf]  ;;  %v4846_v10 = vld [vmem:[#allocation2 + $0x3ec] sm:$0xf0]  ;;  %2336 = vmatpush.bf16.msra.mxu0 %v3395_v3 }
  0x20   :  { %v3378_v11 = vld [vmem:[#allocation2 + $0xc0] sm:$0xf]  ;;  %v3779_v12 = vor.u32 %v4846_v10, %v3778_v9  ;;  %v4746_v13 = vld [vmem:[#allocation2 + $0xcc] sm:$0xf0]  ;;  %2349 = vmatpush.bf16.msra.mxu1 %v3523_v7 }
  0x21   :  { %v3506_v14 = vld [vmem:[#allocation2 + $0x1c0] sm:$0xf]  ;;  %v4778_v15 = vld [vmem:[#allocation2 + $0x1cc] sm:$0xf0]  ;;  %2362 = vmatpush.bf16.msra.mxu2 %v3651_v8  ;;  %v3379_v16 = vor.u32 %v4746_v13, %v3378_v11 }
  0x22   :  { %v3507_v17 = vor.u32 %v4778_v15, %v3506_v14  ;;  %v3634_v18 = vld [vmem:[#allocation2 + $0x2c0] sm:$0xf]  ;;  %v4810_v19 = vld [vmem:[#allocation2 + $0x2cc] sm:$0xf0]  ;;  %2375 = vmatpush.bf16.msra.mxu3 %v3779_v12 }
  0x23   :  { %v3762_v20 = vld [vmem:[#allocation2 + $0x3c0] sm:$0xf]  ;;  %v3635_v21 = vor.u32 %v4810_v19, %v3634_v18  ;;  %v4842_v22 = vld [vmem:[#allocation2 + $0x3cc] sm:$0xf0]  ;;  %2337 = vmatpush.bf16.msra.mxu0 %v3379_v16 }
  0x24   :  { %v3362_v23 = vld [vmem:[#allocation2 + $0xa0] sm:$0xf]  ;;  %v4742_v24 = vld [vmem:[#allocation2 + $0xac] sm:$0xf0]  ;;  %v3763_v25 = vor.u32 %v4842_v22, %v3762_v20  ;;  %2350 = vmatpush.bf16.msra.mxu1 %v3507_v17 }
  0x25   :  { %v3490_v26 = vld [vmem:[#allocation2 + $0x1a0] sm:$0xf]  ;;  %v4774_v27 = vld [vmem:[#allocation2 + $0x1ac] sm:$0xf0]  ;;  %v3363_v29 = vor.u32 %v4742_v24, %v3362_v23  ;;  %2363 = vmatpush.bf16.msra.mxu2 %v3635_v21 }
  0x26   :  { %v3618_v28 = vld [vmem:[#allocation2 + $0x2a0] sm:$0xf]  ;;  %v4806_v30 = vld [vmem:[#allocation2 + $0x2ac] sm:$0xf0]  ;;  %v3491_v33 = vor.u32 %v4774_v27, %v3490_v26  ;;  %2376 = vmatpush.bf16.msra.mxu3 %v3763_v25 }
  0x27   :  { %v3746_v31 = vld [vmem:[#allocation2 + $0x3a0] sm:$0xf]  ;;  %v4838_v32 = vld [vmem:[#allocation2 + $0x3ac] sm:$0xf0]  ;;  %v3619_v34 = vor.u32 %v4806_v30, %v3618_v28  ;;  %2338 = vmatpush.bf16.msra.mxu0 %v3363_v29 }
  0x28   :  { %v3346_v35 = vld [vmem:[#allocation2 + $0x80] sm:$0xf]  ;;  %v4738_v36 = vld [vmem:[#allocation2 + $0x8c] sm:$0xf0]  ;;  %v3747_v38 = vor.u32 %v4838_v32, %v3746_v31  ;;  %2351 = vmatpush.bf16.msra.mxu1 %v3491_v33 }
  0x29   :  { %v3474_v37 = vld [vmem:[#allocation2 + $0x180] sm:$0xf]  ;;  %v4770_v39 = vld [vmem:[#allocation2 + $0x18c] sm:$0xf0]  ;;  %v3347_v44 = vor.u32 %v4738_v36, %v3346_v35  ;;  %2364 = vmatpush.bf16.msra.mxu2 %v3619_v34 }
  0x2a   :  { %v3602_v40 = vld [vmem:[#allocation2 + $0x280] sm:$0xf]  ;;  %v4802_v41 = vld [vmem:[#allocation2 + $0x28c] sm:$0xf0]  ;;  %v3475_v45 = vor.u32 %v4770_v39, %v3474_v37  ;;  %2377 = vmatpush.bf16.msra.mxu3 %v3747_v38 }
  0x2b   :  { %v3730_v42 = vld [vmem:[#allocation2 + $0x380] sm:$0xf]  ;;  %v4834_v43 = vld [vmem:[#allocation2 + $0x38c] sm:$0xf0]  ;;  %v3603_v46 = vor.u32 %v4802_v41, %v3602_v40  ;;  %2339 = vmatpush.bf16.msra.mxu0 %v3347_v44 }
  0x2c   :  { %v3330_v47 = vld [vmem:[#allocation2 + $0x60] sm:$0xf]  ;;  %v4734_v48 = vld [vmem:[#allocation2 + $0x6c] sm:$0xf0]  ;;  %v3731_v50 = vor.u32 %v4834_v43, %v3730_v42  ;;  %2352 = vmatpush.bf16.msra.mxu1 %v3475_v45 }
  0x2d   :  { %v3458_v49 = vld [vmem:[#allocation2 + $0x160] sm:$0xf]  ;;  %v4766_v51 = vld [vmem:[#allocation2 + $0x16c] sm:$0xf0]  ;;  %v3331_v56 = vor.u32 %v4734_v48, %v3330_v47  ;;  %2365 = vmatpush.bf16.msra.mxu2 %v3603_v46 }
  0x2e   :  { %v3586_v52 = vld [vmem:[#allocation2 + $0x260] sm:$0xf]  ;;  %v4798_v53 = vld [vmem:[#allocation2 + $0x26c] sm:$0xf0]  ;;  %v3459_v57 = vor.u32 %v4766_v51, %v3458_v49  ;;  %2378 = vmatpush.bf16.msra.mxu3 %v3731_v50 }
  0x2f   :  { %v3714_v54 = vld [vmem:[#allocation2 + $0x360] sm:$0xf]  ;;  %v4830_v55 = vld [vmem:[#allocation2 + $0x36c] sm:$0xf0]  ;;  %v3587_v58 = vor.u32 %v4798_v53, %v3586_v52  ;;  %2340 = vmatpush.bf16.msra.mxu0 %v3331_v56 }
  0x30   :  { %v3314_v59 = vld [vmem:[#allocation2 + $0x40] sm:$0xf]  ;;  %v4730_v60 = vld [vmem:[#allocation2 + $0x4c] sm:$0xf0]  ;;  %v3715_v62 = vor.u32 %v4830_v55, %v3714_v54  ;;  %2353 = vmatpush.bf16.msra.mxu1 %v3459_v57 }
  0x31   :  { %v3442_v61 = vld [vmem:[#allocation2 + $0x140] sm:$0xf]  ;;  %v4762_v63 = vld [vmem:[#allocation2 + $0x14c] sm:$0xf0]  ;;  %v3315_v4 = vor.u32 %v4730_v60, %v3314_v59  ;;  %2366 = vmatpush.bf16.msra.mxu2 %v3587_v58 }
  0x32   :  { %v3570_v0 = vld [vmem:[#allocation2 + $0x240] sm:$0xf]  ;;  %v4794_v1 = vld [vmem:[#allocation2 + $0x24c] sm:$0xf0]  ;;  %v3443_v5 = vor.u32 %v4762_v63, %v3442_v61  ;;  %2379 = vmatpush.bf16.msra.mxu3 %v3715_v62 }
  0x33   :  { %v3698_v2 = vld [vmem:[#allocation2 + $0x340] sm:$0xf]  ;;  %v4826_v3 = vld [vmem:[#allocation2 + $0x34c] sm:$0xf0]  ;;  %v3571_v6 = vor.u32 %v4794_v1, %v3570_v0  ;;  %2341 = vmatpush.bf16.msra.mxu0 %v3315_v4 }
  0x34   :  { %v3298_v7 = vld [vmem:[#allocation2 + $0x20] sm:$0xf]  ;;  %v4726_v8 = vld [vmem:[#allocation2 + $0x2c] sm:$0xf0]  ;;  %v3699_v10 = vor.u32 %v4826_v3, %v3698_v2  ;;  %2354 = vmatpush.bf16.msra.mxu1 %v3443_v5 }
  0x35   :  { %v3426_v9 = vld [vmem:[#allocation2 + $0x120] sm:$0xf]  ;;  %v4758_v11 = vld [vmem:[#allocation2 + $0x12c] sm:$0xf0]  ;;  %v3299_v16 = vor.u32 %v4726_v8, %v3298_v7  ;;  %2367 = vmatpush.bf16.msra.mxu2 %v3571_v6 }
  0x36   :  { %v3554_v12 = vld [vmem:[#allocation2 + $0x220] sm:$0xf]  ;;  %v4790_v13 = vld [vmem:[#allocation2 + $0x22c] sm:$0xf0]  ;;  %v3427_v20 = vor.u32 %v4758_v11, %v3426_v9  ;;  %2380 = vmatpush.bf16.msra.mxu3 %v3699_v10 }
  0x37   :  { %v3682_v14 = vld [vmem:[#allocation2 + $0x320] sm:$0xf]  ;;  %v4822_v15 = vld [vmem:[#allocation2 + $0x32c] sm:$0xf0]  ;;  %v3555_v21 = vor.u32 %v4790_v13, %v3554_v12  ;;  %2342 = vmatpush.bf16.msra.mxu0 %v3299_v16 }
  0x38   :  { %v3282_v17 = vld [vmem:[#allocation2] sm:$0xf]  ;;  %v4722_v18 = vld [vmem:[#allocation2 + $0xc] sm:$0xf0]  ;;  %v3683_v25 = vor.u32 %v4822_v15, %v3682_v14  ;;  %2355 = vmatpush.bf16.msra.mxu1 %v3427_v20 }
  0x39   :  { %v3410_v19 = vld [vmem:[#allocation2 + $0x100] sm:$0xf]  ;;  %v4754_v22 = vld [vmem:[#allocation2 + $0x10c] sm:$0xf0]  ;;  %v3283_v32 = vor.u32 %v4722_v18, %v3282_v17  ;;  %2368 = vmatpush.bf16.msra.mxu2 %v3555_v21 }
  0x3a   :  { %v3538_v23 = vld [vmem:[#allocation2 + $0x200] sm:$0xf]  ;;  %v4786_v24 = vld [vmem:[#allocation2 + $0x20c] sm:$0xf0]  ;;  %v3411_v36 = vor.u32 %v4754_v22, %v3410_v19  ;;  %2381 = vmatpush.bf16.msra.mxu3 %v3683_v25 }
  0x3b   :  { %v3666_v26 = vld [vmem:[#allocation2 + $0x300] sm:$0xf]  ;;  %v4818_v27 = vld [vmem:[#allocation2 + $0x30c] sm:$0xf0]  ;;  %v3539_v37 = vor.u32 %v4786_v24, %v3538_v23  ;;  %2343 = vmatpush.bf16.msra.mxu0 %v3283_v32 }
  0x3c   :  { %v3906_v28 = vld [vmem:[#allocation2 + $0x4e0] sm:$0xf]  ;;  %v4878_v29 = vld [vmem:[#allocation2 + $0x4ec] sm:$0xf0]  ;;  %v3667_v41 = vor.u32 %v4818_v27, %v3666_v26  ;;  %2356 = vmatpush.bf16.msra.mxu1 %v3411_v36 }
  0x3d   :  { %v4034_v30 = vld [vmem:[#allocation2 + $0x5e0] sm:$0xf]  ;;  %v4910_v31 = vld [vmem:[#allocation2 + $0x5ec] sm:$0xf0]  ;;  %v3907_v42 = vor.u32 %v4878_v29, %v3906_v28  ;;  %2369 = vmatpush.bf16.msra.mxu2 %v3539_v37 }
  0x3e   :  { %v4162_v33 = vld [vmem:[#allocation2 + $0x6e0] sm:$0xf]  ;;  %v4942_v34 = vld [vmem:[#allocation2 + $0x6ec] sm:$0xf0]  ;;  %v4035_v46 = vor.u32 %v4910_v31, %v4034_v30  ;;  %2382 = vmatpush.bf16.msra.mxu3 %v3667_v41 }
  0x3f   :  { %v4290_v35 = vld [vmem:[#allocation2 + $0x7e0] sm:$0xf]  ;;  %v4974_v38 = vld [vmem:[#allocation2 + $0x7ec] sm:$0xf0]  ;;  %v4163_v47 = vor.u32 %v4942_v34, %v4162_v33  ;;  %2388 = vmatpush.bf16.msrb.mxu0 %v3907_v42 }
  0x40   :  { %v3890_v39 = vld [vmem:[#allocation2 + $0x4c0] sm:$0xf]  ;;  %v4874_v40 = vld [vmem:[#allocation2 + $0x4cc] sm:$0xf0]  ;;  %v4291_v51 = vor.u32 %v4974_v38, %v4290_v35  ;;  %2401 = vmatpush.bf16.msrb.mxu1 %v4035_v46 }
  0x41   :  { %v5341_v43 = vld [vmem:[#allocation2 + $0x5c0] sm:$0xf]  ;;  %v5343_v44 = vld [vmem:[#allocation2 + $0x5cc] sm:$0xf0]  ;;  %v3891_v4 = vor.u32 %v4874_v40, %v3890_v39  ;;  %2414 = vmatpush.bf16.msrb.mxu2 %v4163_v47 }
  0x42   :  { %v5345_v45 = vld [vmem:[#allocation2 + $0x6c0] sm:$0xf]  ;;  %v4938_v48 = vld [vmem:[#allocation2 + $0x6cc] sm:$0xf0]  ;;  %v4019_v9 = vor.u32 %v5343_v44, %v5341_v43  ;;  %2427 = vmatpush.bf16.msrb.mxu3 %v4291_v51  ;;  %v118_v51 = vld [vmem:[%s5799_s0 + $0x18] sm:$0xff] }
  0x43   :  { %v5347_v49 = vld [vmem:[#allocation2 + $0x7c0] sm:$0xf]  ;;  %v5349_v50 = vld [vmem:[#allocation2 + $0x7cc] sm:$0xf0]  ;;  %v4147_v10 = vor.u32 %v4938_v48, %v5345_v45  ;;  %2389 = vmatpush.bf16.msrb.mxu0 %v3891_v4 }
  0x44   :  { %v5351_v52 = vld [vmem:[#allocation2 + $0x4a0] sm:$0xf]  ;;  %v5353_v53 = vld [vmem:[#allocation2 + $0x4ac] sm:$0xf0]  ;;  %v4275_v16 = vor.u32 %v5349_v50, %v5347_v49  ;;  %2402 = vmatpush.bf16.msrb.mxu1 %v4019_v9 }
  0x45   :  { %v5355_v54 = vld [vmem:[#allocation2 + $0x5a0] sm:$0xf]  ;;  %v5357_v55 = vld [vmem:[#allocation2 + $0x5ac] sm:$0xf0]  ;;  %v3875_v20 = vor.u32 %v5353_v53, %v5351_v52  ;;  %2415 = vmatpush.bf16.msrb.mxu2 %v4147_v10  ;;  %v128_v52 = vld [vmem:[%s5799_s0 + $0x68] sm:$0xff] }
  0x46   :  { %v5359_v56 = vld [vmem:[#allocation2 + $0x6a0] sm:$0xf]  ;;  %v5361_v57 = vld [vmem:[#allocation2 + $0x6ac] sm:$0xf0]  ;;  %v4003_v21 = vor.u32 %v5357_v55, %v5355_v54  ;;  %2428 = vmatpush.bf16.msrb.mxu3 %v4275_v16  ;;  %v138_v53 = vld [vmem:[%s5799_s0 + $0xb8] sm:$0xff] }
  0x47   :  { %v5363_v58 = vld [vmem:[#allocation2 + $0x7a0] sm:$0xf]  ;;  %v5365_v59 = vld [vmem:[#allocation2 + $0x7ac] sm:$0xf0]  ;;  %v4131_v22 = vor.u32 %v5361_v57, %v5359_v56  ;;  %2390 = vmatpush.bf16.msrb.mxu0 %v3875_v20  ;;  %v148_v57 = vld [vmem:[%s5799_s0 + $0x108] sm:$0xff] }
  0x48   :  { %v5367_v60 = vld [vmem:[#allocation2 + $0x480] sm:$0xf]  ;;  %v5369_v61 = vld [vmem:[#allocation2 + $0x48c] sm:$0xf0]  ;;  %v4259_v23 = vor.u32 %v5365_v59, %v5363_v58  ;;  %v176_v58 = vadd.f32 %v128_v52, %v118_v51  ;;  %2403 = vmatpush.bf16.msrb.mxu1 %v4003_v21  ;;  %v246_v10 = vadd.f32 %v148_v57, %v138_v53 }
  0x49   :  { %v5371_v62 = vld [vmem:[#allocation2 + $0x580] sm:$0xf]  ;;  %v5373_v63 = vld [vmem:[#allocation2 + $0x58c] sm:$0xf0]  ;;  %v3859_v27 = vor.u32 %v5369_v61, %v5367_v60  ;;  %2416 = vmatpush.bf16.msrb.mxu2 %v4131_v22  ;;  %v116_v22 = vld [vmem:[%s5799_s0 + $0x8] sm:$0xff] }
  0x4a   :  { %v5375_v0 = vld [vmem:[#allocation2 + $0x680] sm:$0xf]  ;;  %v5377_v1 = vld [vmem:[#allocation2 + $0x68c] sm:$0xf0]  ;;  %v3987_v28 = vor.u32 %v5373_v63, %v5371_v62  ;;  %2429 = vmatpush.bf16.msrb.mxu3 %v4259_v23  ;;  %v247_v23 = vrot.slane %v246_v10, 4 }
  0x4b   :  { %v5379_v2 = vld [vmem:[#allocation2 + $0x780] sm:$0xf]  ;;  %v5381_v3 = vld [vmem:[#allocation2 + $0x78c] sm:$0xf0]  ;;  %v4115_v29 = vor.u32 %v5377_v1, %v5375_v0  ;;  %2391 = vmatpush.bf16.msrb.mxu0 %v3859_v27  ;;  %v146_v27 = vld [vmem:[%s5799_s0 + $0xf8] sm:$0xff] }
  0x4c   :  { %v5383_v5 = vld [vmem:[#allocation2 + $0x460] sm:$0xf]  ;;  %v5385_v6 = vld [vmem:[#allocation2 + $0x46c] sm:$0xf0]  ;;  %v4243_v30 = vor.u32 %v5381_v3, %v5379_v2  ;;  %2404 = vmatpush.bf16.msrb.mxu1 %v3987_v28 }
  0x4d   :  { %v5387_v7 = vld [vmem:[#allocation2 + $0x560] sm:$0xf]  ;;  %v5389_v8 = vld [vmem:[#allocation2 + $0x56c] sm:$0xf0]  ;;  %v3843_v34 = vor.u32 %v5385_v6, %v5383_v5  ;;  %2417 = vmatpush.bf16.msrb.mxu2 %v4115_v29 }
  0x4e   :  { %v5394_v11 = vld [vmem:[#allocation2 + $0x660] sm:$0xf]  ;;  %v5396_v12 = vld [vmem:[#allocation2 + $0x66c] sm:$0xf0]  ;;  %v3971_v35 = vor.u32 %v5389_v8, %v5387_v7  ;;  %2430 = vmatpush.bf16.msrb.mxu3 %v4243_v30 }
  0x4f   :  { %v5398_v13 = vld [vmem:[#allocation2 + $0x760] sm:$0xf]  ;;  %v5400_v14 = vld [vmem:[#allocation2 + $0x76c] sm:$0xf0]  ;;  %v4099_v40 = vor.u32 %v5396_v12, %v5394_v11  ;;  %2392 = vmatpush.bf16.msrb.mxu0 %v3843_v34 }
  0x50   :  { %v5402_v15 = vld [vmem:[#allocation2 + $0x440] sm:$0xf]  ;;  %v5406_v17 = vld [vmem:[#allocation2 + $0x44c] sm:$0xf0]  ;;  %v4227_v41 = vor.u32 %v5400_v14, %v5398_v13  ;;  %2405 = vmatpush.bf16.msrb.mxu1 %v3971_v35 }
  0x51   :  { %v5408_v18 = vld [vmem:[#allocation2 + $0x540] sm:$0xf]  ;;  %v5410_v19 = vld [vmem:[#allocation2 + $0x54c] sm:$0xf0]  ;;  %v3827_v42 = vor.u32 %v5406_v17, %v5402_v15  ;;  %2418 = vmatpush.bf16.msrb.mxu2 %v4099_v40 }
  0x52   :  { %v5420_v24 = vld [vmem:[#allocation2 + $0x640] sm:$0xf]  ;;  %v5422_v25 = vld [vmem:[#allocation2 + $0x64c] sm:$0xf0]  ;;  %v3955_v47 = vor.u32 %v5410_v19, %v5408_v18  ;;  %2431 = vmatpush.bf16.msrb.mxu3 %v4227_v41 }
  0x53   :  { %v5424_v26 = vld [vmem:[#allocation2 + $0x740] sm:$0xf]  ;;  %v5434_v31 = vld [vmem:[#allocation2 + $0x74c] sm:$0xf0]  ;;  %v4083_v54 = vor.u32 %v5422_v25, %v5420_v24  ;;  %2393 = vmatpush.bf16.msrb.mxu0 %v3827_v42 }
  0x54   :  { %v117_v32 = vld [vmem:[%s5799_s0 + $0x10] sm:$0xff]  ;;  %v127_v33 = vld [vmem:[%s5799_s0 + $0x60] sm:$0xff]  ;;  %v4211_v55 = vor.u32 %v5434_v31, %v5424_v26  ;;  %2406 = vmatpush.bf16.msrb.mxu1 %v3955_v47 }
  0x55   :  { %v137_v36 = vld [vmem:[%s5799_s0 + $0xb0] sm:$0xff]  ;;  %v147_v37 = vld [vmem:[%s5799_s0 + $0x100] sm:$0xff]  ;;  %v169_v38 = vadd.f32 %v127_v33, %v117_v32  ;;  %v177_v33 = vrot.slane %v176_v58, 4  ;;  %2419 = vmatpush.bf16.msrb.mxu2 %v4083_v54 }
  0x56   :  { %v115_v39 = vld [vmem:[%s5799_s0] sm:$0xff]  ;;  %v239_v43 = vadd.f32 %v147_v37, %v137_v36  ;;  %v125_v44 = vld [vmem:[%s5799_s0 + $0x50] sm:$0xff]  ;;  %2432 = vmatpush.bf16.msrb.mxu3 %v4211_v55 }
  0x57   :  { %v135_v45 = vld [vmem:[%s5799_s0 + $0xa0] sm:$0xff]  ;;  %v145_v46 = vld [vmem:[%s5799_s0 + $0xf0] sm:$0xff]  ;;  %v170_v48 = vrot.slane %v169_v38, 4  ;;  %v155_v49 = vadd.f32 %v125_v44, %v115_v39  ;;  %v178_v51 = vadd.f32 %v177_v33, %v176_v58 }
  0x58   :  { %v225_v50 = vadd.f32 %v145_v46, %v135_v45  ;;  %v240_v56 = vrot.slane %v239_v43, 4  ;;  %v5488_v59 = vld [vmem:[#allocation2 + $0x420] sm:$0xf]  ;;  %v5490_v60 = vld [vmem:[#allocation2 + $0x42c] sm:$0xf0] }
  0x59   :  { %v171_v61 = vadd.f32 %v170_v48, %v169_v38  ;;  %v156_v4 = vrot.slane %v155_v49, 4  ;;  %v5492_v16 = vld [vmem:[#allocation2 + $0x520] sm:$0xf]  ;;  %v5494_v20 = vld [vmem:[#allocation2 + $0x52c] sm:$0xf0]  ;;  %v3811_v36 = vor.u32 %v5490_v60, %v5488_v59  ;;  %v179_v33 = vrot.slane %v178_v51, 2 }
  0x5a   :  { %v226_v9 = vrot.slane %v225_v50, 4  ;;  %v241_v32 = vadd.f32 %v240_v56, %v239_v43  ;;  %v5500_v39 = vld [vmem:[#allocation2 + $0x620] sm:$0xf]  ;;  %v5502_v21 = vld [vmem:[#allocation2 + $0x62c] sm:$0xf0]  ;;  %v126_v56 = vld [vmem:[%s5799_s0 + $0x58] sm:$0xff] }
  0x5b   :  { %v172_v38 = vrot.slane %v171_v61, 2  ;;  %v157_v44 = vadd.f32 %v156_v4, %v155_v49  ;;  %v5507_v43 = vld [vmem:[#allocation2 + $0x720] sm:$0xf]  ;;  %v5509_v46 = vld [vmem:[#allocation2 + $0x72c] sm:$0xf0]  ;;  %v136_v49 = vld [vmem:[%s5799_s0 + $0xa8] sm:$0xff]  ;;  %v248_v4 = vadd.f32 %v247_v23, %v246_v10  ;;  %v162_v53 = vadd.f32 %v126_v56, %v116_v22  ;;  %2394 = vmatpush.bf16.msrb.mxu0 %v3811_v36 }
  0x5c   :  { %v227_v45 = vadd.f32 %v226_v9, %v225_v50  ;;  %v242_v48 = vrot.slane %v241_v32, 2  ;;  %v232_v52 = vadd.f32 %v146_v27, %v136_v49  ;;  %v180_v1 = vadd.f32 %v179_v33, %v178_v51  ;;  %v4850_v23 = vld [vmem:[#allocation2 + $0x40c] sm:$0xf0]  ;;  %v3922_v18 = vld [vmem:[#allocation2 + $0x500] sm:$0xf] }
  0x5d   :  { %v173_v50 = vadd.f32 %v172_v38, %v171_v61  ;;  %v158_v57 = vrot.slane %v157_v44, 2  ;;  %v249_v28 = vrot.slane %v248_v4, 2  ;;  %v163_v29 = vrot.slane %v162_v53, 4  ;;  %v4882_v25 = vld [vmem:[#allocation2 + $0x50c] sm:$0xf0] }
  0x5e   :  { %v228_v58 = vrot.slane %v227_v45, 2  ;;  %v243_v9 = vadd.f32 %v242_v48, %v241_v32  ;;  %v233_v61 = vrot.slane %v232_v52, 4  ;;  %v181_v6 = vrot.slane %v180_v1, 1  ;;  %v4050_v54 = vld [vmem:[#allocation2 + $0x600] sm:$0xf] }
  0x5f   :  { %v174_v37 = vrot.slane %v173_v50, 1  ;;  %v159_v62 = vadd.f32 %v158_v57, %v157_v44  ;;  %v250_v10 = vadd.f32 %v249_v28, %v248_v4  ;;  %v164_v34 = vadd.f32 %v163_v29, %v162_v53  ;;  %v3794_v44 = vld [vmem:[#allocation2 + $0x400] sm:$0xf]  ;;  %v4914_v55 = vld [vmem:[#allocation2 + $0x60c] sm:$0xf0] }
  0x60   :  { %v229_v63 = vadd.f32 %v228_v58, %v227_v45  ;;  %v244_v0 = vrot.slane %v243_v9, 1  ;;  %v234_v32 = vadd.f32 %v233_v61, %v232_v52  ;;  %v182_v12 = vadd.f32 %v181_v6, %v180_v1  ;;  %v4178_v53 = vld [vmem:[#allocation2 + $0x700] sm:$0xf]  ;;  %v4946_v4 = vld [vmem:[#allocation2 + $0x70c] sm:$0xf0] }
  0x61   :  { %v175_v2 = vadd.f32 %v174_v37, %v173_v50  ;;  %v160_v3 = vrot.slane %v159_v62, 1  ;;  %v251_v8 = vrot.slane %v250_v10, 1  ;;  %v165_v35 = vrot.slane %v164_v34, 2  ;;  %v5006_v59 = vld [vmem:[#allocation2 + $0x8ec] sm:$0xf0] }
  0x62   :  { %v230_v30 = vrot.slane %v229_v63, 1  ;;  %v245_v5 = vadd.f32 %v244_v0, %v243_v9  ;;  %v235_v40 = vrot.slane %v234_v32, 2  ;;  %v298_v17 = vmul.f32 0.0625, %v182_v12  ;;  %v4418_v9 = vld [vmem:[#allocation2 + $0x8e0] sm:$0xf] }
  0x63   :  { %v297_v22 = vmul.f32 0.0625, %v175_v2  ;;  %v161_v38 = vadd.f32 %v160_v3, %v159_v62  ;;  %v252_v37 = vadd.f32 %v251_v8, %v250_v10  ;;  %v166_v42 = vadd.f32 %v165_v35, %v164_v34  ;;  %v5570_v28 = vld [vmem:[#allocation2 + $0x9e0] sm:$0xf]  ;;  %v3524_v0 = vld [vmem:[#allocation2 + $0x1f0] sm:$0xf0] }
  0x64   :  { %v231_v7 = vadd.f32 %v230_v30, %v229_v63  ;;  %v307_v11 = vmul.f32 0.0625, %v245_v5  ;;  %v236_v45 = vadd.f32 %v235_v40, %v234_v32  ;;  %v318_v52 = vpack.c.bf16 %v298_v17, %v298_v17  ;;  %v5577_v3 = vld [vmem:[#allocation2 + $0x8c0] sm:$0xf]  ;;  %v5583_v30 = vld [vmem:[#allocation2 + $0x9cc] sm:$0xf0] }
  0x65   :  { %v317_v13 = vpack.c.bf16 %v297_v22, %v297_v22  ;;  %v295_v14 = vmul.f32 0.0625, %v161_v38  ;;  %v308_v24 = vmul.f32 0.0625, %v252_v37  ;;  %v167_v26 = vrot.slane %v166_v42, 1  ;;  %v5587_v32 = vld [vmem:[#allocation2 + $0xc4] sm:$0xf]  ;;  %v121_v38 = vld [vmem:[%s5799_s0 + $0x30] sm:$0xff] }
  0x66   :  { %v305_v41 = vmul.f32 0.0625, %v231_v7  ;;  %v327_v15 = vpack.c.bf16 %v307_v11, %v307_v11  ;;  %v237_v31 = vrot.slane %v236_v45, 1  ;;  %v5807_v50 = vor.u32 %v5494_v20, %v5492_v16  ;;  %v5572_v16 = vld [vmem:[#allocation2 + $0x9ec] sm:$0xf0]  ;;  %v4748_v20 = vld [vmem:[#allocation2 + $0xe4] sm:$0xf] }
  0x67   :  { %v687_v19 = vunpack.c.l.b16 %v317_v13  ;;  %v315_v47 = vpack.c.bf16 %v295_v14, %v295_v14  ;;  %v328_v27 = vpack.c.bf16 %v308_v24, %v308_v24  ;;  %v5808_v57 = vor.u32 %v5502_v21, %v5500_v39  ;;  %v3396_v39 = vld [vmem:[#allocation2 + $0xf0] sm:$0xf0]  ;;  %v4780_v21 = vld [vmem:[#allocation2 + $0x1e4] sm:$0xf]  ;;  %v4998_v17 = vld [vmem:[#allocation2 + $0x8ac] sm:$0xf0] }
  0x68   :  { %v325_v48 = vpack.c.bf16 %v305_v41, %v305_v41  ;;  %v697_v51 = vunpack.c.l.b16 %v327_v15  ;;  %2407 = vmatpush.bf16.msrb.mxu1 %v5807_v50  ;;  %v3795_v58 = vor.u32 %v4850_v23, %v3794_v44  ;;  %v688_v36 = vunpack.c.l.b16 %v318_v52  ;;  %v5589_v22 = vld [vmem:[#allocation2 + $0xd0] sm:$0xf0]  ;;  %v131_v7 = vld [vmem:[%s5799_s0 + $0x80] sm:$0xff] }
  0x69   :  { %v685_v56 = vunpack.c.l.b16 %v315_v47  ;;  %2420 = vmatpush.bf16.msrb.mxu2 %v5808_v57  ;;  %v5809_v33 = vor.u32 %v5509_v46, %v5507_v43  ;;  %v168_v62 = vadd.f32 %v167_v26, %v166_v42  ;;  %v238_v63 = vadd.f32 %v237_v31, %v236_v45  ;;  %v5579_v43 = vld [vmem:[#allocation2 + $0x8cc] sm:$0xf0]  ;;  %v5581_v46 = vld [vmem:[#allocation2 + $0x9c0] sm:$0xf]  ;;  %v5599_v35 = vld [vmem:[#allocation2 + $0x1c4] sm:$0xf] }
  0x6a   :  { %v695_v49 = vunpack.c.l.b16 %v325_v48  ;;  %v708_v60 = vsel %vm705_vm0, %v697_v51, %v687_v19  ;;  %v698_v61 = vunpack.c.l.b16 %v328_v27  ;;  %v3923_v2 = vor.u32 %v4882_v25, %v3922_v18  ;;  %2395 = vmatpush.bf16.msrb.mxu0 %v3795_v58  ;;  %v3508_v40 = vld [vmem:[#allocation2 + $0x1d0] sm:$0xf0]  ;;  %v151_v14 = vld [vmem:[%s5799_s0 + $0x120] sm:$0xff]  ;;  %v5614_v45 = vld [vmem:[#allocation2 + $0x9ac] sm:$0xf0] }
  0x6b   :  { %2433 = vmatpush.bf16.msrb.mxu3 %v5809_v33  ;;  %v5574_v1 = vpack.c.b16 %v708_v60, %v708_v60  ;;  %v296_v5 = vmul.f32 0.0625, %v168_v62  ;;  %v306_v6 = vmul.f32 0.0625, %v238_v63  ;;  %v4051_v34 = vor.u32 %v4914_v55, %v4050_v54  ;;  %v141_v13 = vld [vmem:[%s5799_s0 + $0xd0] sm:$0xff]  ;;  %v5607_v41 = vld [vmem:[#allocation2 + $0x8a0] sm:$0xf]  ;;  %v122_v57 = vld [vmem:[%s5799_s0 + $0x38] sm:$0xff] }
  0x6c   :  { %v706_v29 = vsel %vm705_vm0, %v695_v49, %v685_v56  ;;  %v709_v8 = vsel %vm705_vm0, %v698_v61, %v688_v36  ;;  %2408 = vmatpush.bf16.msrb.mxu1 %v3923_v2  ;;  %v4179_v11 = vor.u32 %v4946_v4, %v4178_v53  ;;  %v4419_v12 = vor.u32 %v5006_v59, %v4418_v9  ;;  %v5612_v42 = vld [vmem:[#allocation2 + $0x9a0] sm:$0xf]  ;;  %v4740_v47 = vld [vmem:[#allocation2 + $0xa4] sm:$0xf]  ;;  %v3364_v48 = vld [vmem:[#allocation2 + $0xb0] sm:$0xf0] }
  0x6d   :  { %v5585_v10 = vpack.c.b16 %v706_v29, %v706_v29  ;;  %2370 = vmatmul.bf16.vlgmr.msra.gmra.mxu2 %v5574_v1  ;;  %v5610_v37 = vpack.c.b16 %v709_v8, %v709_v8  ;;  %v316_v44 = vpack.c.bf16 %v296_v5, %v296_v5  ;;  %v326_v15 = vpack.c.bf16 %v306_v6, %v306_v6  ;;  %v5618_v24 = vld [vmem:[#allocation2 + $0x1a4] sm:$0xf]  ;;  %v129_v54 = vld [vmem:[%s5799_s0 + $0x70] sm:$0xff]  ;;  %v132_v58 = vld [vmem:[%s5799_s0 + $0x88] sm:$0xff] }
  0x6e   :  { %2421 = vmatpush.bf16.msrb.mxu2 %v4051_v34  ;;  %v4547_v23 = vor.u32 %v5572_v16, %v5570_v28  ;;  %v3399_v18 = vor.u32 %v4748_v20, %v3396_v39  ;;  %v3527_v19 = vor.u32 %v4780_v21, %v3524_v0  ;;  %v119_v25 = vld [vmem:[%s5799_s0 + $0x20] sm:$0xff]  ;;  %v4403_v26 = vor.u32 %v5579_v43, %v5577_v3  ;;  %v3492_v55 = vld [vmem:[#allocation2 + $0x1b0] sm:$0xf0]  ;;  %v142_v4 = vld [vmem:[%s5799_s0 + $0xd8] sm:$0xff] }
  0x6f   :  { %2344 = vmatmul.bf16.vlgmr.msra.gmra.mxu0 %v5585_v10  ;;  %2434 = vmatpush.bf16.msrb.mxu3 %v4179_v11  ;;  %v686_v51 = vunpack.c.l.b16 %v316_v44  ;;  %v696_v52 = vunpack.c.l.b16 %v326_v15  ;;  %v4531_v31 = vor.u32 %v5583_v30, %v5581_v46  ;;  %v139_v53 = vld [vmem:[%s5799_s0 + $0xc0] sm:$0xff]  ;;  %v149_v56 = vld [vmem:[%s5799_s0 + $0x110] sm:$0xff]  ;;  %v3383_v49 = vor.u32 %v5587_v32, %v5589_v22  ;;  %v152_v33 = vld [vmem:[%s5799_s0 + $0x128] sm:$0xff] }
  0x70   :  { %2440 = vmatpush.bf16.msra.mxu0 %v4419_v12  ;;  %2383 = vmatmul.bf16.vlgmr.msra.gmra.mxu3 %v5610_v37  ;;  %v3511_v27 = vor.u32 %v5599_v35, %v3508_v40  ;;  %v197_v50 = vadd.f32 %v131_v7, %v121_v38  ;;  %v267_v59 = vadd.f32 %v151_v14, %v141_v13  ;;  %v120_v62 = vld [vmem:[%s5799_s0 + $0x28] sm:$0xff]  ;;  %v130_v63 = vld [vmem:[%s5799_s0 + $0x78] sm:$0xff] }
  0x71   :  { %v707_v9 = vsel %vm705_vm0, %v696_v52, %v686_v51  ;;  %v4387_v60 = vor.u32 %v4998_v17, %v5607_v41  ;;  %v4515_v36 = vor.u32 %v5614_v45, %v5612_v42  ;;  %v3367_v20 = vor.u32 %v4740_v47, %v3364_v48  ;;  %v140_v2 = vld [vmem:[%s5799_s0 + $0xc8] sm:$0xff]  ;;  %v150_v3 = vld [vmem:[%s5799_s0 + $0x118] sm:$0xff] }
  0x72   :  { %2466 = vmatpush.bf16.msra.mxu2 %v3399_v18  ;;  %v5662_v28 = vpack.c.b16 %v707_v9, %v707_v9  ;;  %v198_v16 = vrot.slane %v197_v50, 4  ;;  %v3495_v39 = vor.u32 %v5618_v24, %v3492_v55  ;;  %v268_v21 = vrot.slane %v267_v59, 4 }
  0x73   :  { %2479 = vmatpush.bf16.msra.mxu3 %v3527_v19  ;;  %v183_v0 = vadd.f32 %v129_v54, %v119_v25  ;;  %v253_v29 = vadd.f32 %v149_v56, %v139_v53  ;;  %v204_v61 = vadd.f32 %v132_v58, %v122_v57  ;;  %v274_v46 = vadd.f32 %v152_v33, %v142_v4 }
  0x74   :  { %2441 = vmatpush.bf16.msra.mxu0 %v4403_v26  ;;  %2357 = vmatmul.bf16.vlgmr.msra.gmra.mxu1 %v5662_v28  ;;  %v199_v43 = vadd.f32 %v198_v16, %v197_v50  ;;  %v190_v30 = vadd.f32 %v130_v63, %v120_v62  ;;  %v269_v5 = vadd.f32 %v268_v21, %v267_v59 }
  0x75   :  { %2453 = vmatpush.bf16.msra.mxu1 %v4547_v23  ;;  %v184_v6 = vrot.slane %v183_v0, 4  ;;  %v254_v34 = vrot.slane %v253_v29, 4  ;;  %v205_v32 = vrot.slane %v204_v61, 4  ;;  %v275_v38 = vrot.slane %v274_v46, 4 }
  0x76   :  { %2467 = vmatpush.bf16.msra.mxu2 %v3383_v49  ;;  %v200_v22 = vrot.slane %v199_v43, 2  ;;  %v191_v7 = vrot.slane %v190_v30, 4  ;;  %v260_v8 = vadd.f32 %v150_v3, %v140_v2  ;;  %v270_v11 = vrot.slane %v269_v5, 2 }
  0x77   :  { %2480 = vmatpush.bf16.msra.mxu3 %v3511_v27  ;;  %v185_v12 = vadd.f32 %v184_v6, %v183_v0  ;;  %v255_v35 = vadd.f32 %v254_v34, %v253_v29  ;;  %v206_v40 = vadd.f32 %v205_v32, %v204_v61  ;;  %v276_v14 = vadd.f32 %v275_v38, %v274_v46  ;;  %v4994_v29 = vld [vmem:[#allocation2 + $0x88c] sm:$0xf0]  ;;  %v4498_v46 = vld [vmem:[#allocation2 + $0x980] sm:$0xf]  ;;  %v3348_v38 = vld [vmem:[#allocation2 + $0x90] sm:$0xf0] }
  0x78   :  { %2442 = vmatpush.bf16.msra.mxu0 %v4387_v60  ;;  %v201_v13 = vadd.f32 %v200_v22, %v199_v43  ;;  %v192_v41 = vadd.f32 %v191_v7, %v190_v30  ;;  %v261_v44 = vrot.slane %v260_v8, 4  ;;  %v271_v15 = vadd.f32 %v270_v11, %v269_v5  ;;  %v5026_v32 = vld [vmem:[#allocation2 + $0x98c] sm:$0xf0]  ;;  %v4736_v22 = vld [vmem:[#allocation2 + $0x84] sm:$0xf] }
  0x79   :  { %2454 = vmatpush.bf16.msra.mxu1 %v4531_v31  ;;  %v186_v17 = vrot.slane %v185_v12, 2  ;;  %v256_v42 = vrot.slane %v255_v35, 2  ;;  %v207_v45 = vrot.slane %v206_v40, 2  ;;  %v277_v18 = vrot.slane %v276_v14, 2 }
  0x7a   :  { %2468 = vmatpush.bf16.msra.mxu2 %v3367_v20  ;;  %v202_v23 = vrot.slane %v201_v13, 1  ;;  %v193_v19 = vrot.slane %v192_v41, 2  ;;  %v262_v47 = vadd.f32 %v261_v44, %v260_v8  ;;  %v272_v48 = vrot.slane %v271_v15, 1  ;;  %v4370_v20 = vld [vmem:[#allocation2 + $0x880] sm:$0xf] }
  0x7b   :  { %2481 = vmatpush.bf16.msra.mxu3 %v3495_v39  ;;  %v187_v24 = vadd.f32 %v186_v17, %v185_v12  ;;  %v257_v25 = vadd.f32 %v256_v42, %v255_v35  ;;  %v208_v54 = vadd.f32 %v207_v45, %v206_v40  ;;  %v278_v52 = vadd.f32 %v277_v18, %v276_v14  ;;  %v4768_v35 = vld [vmem:[#allocation2 + $0x184] sm:$0xf]  ;;  %v3476_v40 = vld [vmem:[#allocation2 + $0x190] sm:$0xf0]  ;;  %v4990_v17 = vld [vmem:[#allocation2 + $0x86c] sm:$0xf0] }
  0x7c   :  { %v203_v51 = vadd.f32 %v202_v23, %v201_v13  ;;  %v194_v26 = vadd.f32 %v193_v19, %v192_v41  ;;  %v263_v55 = vrot.slane %v262_v47, 2  ;;  %v273_v53 = vadd.f32 %v272_v48, %v271_v15  ;;  %v4354_v15 = vld [vmem:[#allocation2 + $0x860] sm:$0xf]  ;;  %v3332_v48 = vld [vmem:[#allocation2 + $0x70] sm:$0xf0] }
  0x7d   :  { %2455 = vmatpush.bf16.msra.mxu1 %v4515_v36  ;;  %v188_v31 = vrot.slane %v187_v24, 1  ;;  %v258_v56 = vrot.slane %v257_v25, 1  ;;  %v209_v49 = vrot.slane %v208_v54, 1  ;;  %v279_v50 = vrot.slane %v278_v52, 1  ;;  %v4482_v19 = vld [vmem:[#allocation2 + $0x960] sm:$0xf] }
  0x7e   :  { %v301_v27 = vmul.f32 0.0625, %v203_v51  ;;  %v195_v57 = vrot.slane %v194_v26, 1  ;;  %v264_v58 = vadd.f32 %v263_v55, %v262_v47  ;;  %v311_v4 = vmul.f32 0.0625, %v273_v53  ;;  %v4732_v47 = vld [vmem:[#allocation2 + $0x64] sm:$0xf] }
  0x7f   :  { %v189_v9 = vadd.f32 %v188_v31, %v187_v24  ;;  %v259_v59 = vadd.f32 %v258_v56, %v257_v25  ;;  %v210_v60 = vadd.f32 %v209_v49, %v208_v54  ;;  %v280_v62 = vadd.f32 %v279_v50, %v278_v52  ;;  %v5022_v52 = vld [vmem:[#allocation2 + $0x96c] sm:$0xf0]  ;;  %v3460_v55 = vld [vmem:[#allocation2 + $0x170] sm:$0xf0] }
  0x80   :  { %v321_v33 = vpack.c.bf16 %v301_v27, %v301_v27  ;;  %v196_v63 = vadd.f32 %v195_v57, %v194_v26  ;;  %v265_v16 = vrot.slane %v264_v58, 1  ;;  %v331_v39 = vpack.c.bf16 %v311_v4, %v311_v4  ;;  %v4764_v26 = vld [vmem:[#allocation2 + $0x164] sm:$0xf]  ;;  %v4338_v27 = vld [vmem:[#allocation2 + $0x840] sm:$0xf] }
  0x81   :  { %v299_v21 = vmul.f32 0.0625, %v189_v9  ;;  %v309_v0 = vmul.f32 0.0625, %v259_v59  ;;  %v302_v36 = vmul.f32 0.0625, %v210_v60  ;;  %v312_v2 = vmul.f32 0.0625, %v280_v62  ;;  %v4986_v50 = vld [vmem:[#allocation2 + $0x84c] sm:$0xf0] }
  0x82   :  { %v691_v61 = vunpack.c.l.b16 %v321_v33  ;;  %v266_v3 = vadd.f32 %v265_v16, %v264_v58  ;;  %v300_v43 = vmul.f32 0.0625, %v196_v63  ;;  %v701_v30 = vunpack.c.l.b16 %v331_v39  ;;  %v4466_v4 = vld [vmem:[#allocation2 + $0x940] sm:$0xf]  ;;  %v5018_v33 = vld [vmem:[#allocation2 + $0x94c] sm:$0xf0] }
  0x83   :  { %v319_v5 = vpack.c.bf16 %v299_v21, %v299_v21  ;;  %v329_v6 = vpack.c.bf16 %v309_v0, %v309_v0  ;;  %v322_v34 = vpack.c.bf16 %v302_v36, %v302_v36  ;;  %v332_v7 = vpack.c.bf16 %v312_v2, %v312_v2  ;;  %v4728_v62 = vld [vmem:[#allocation2 + $0x44] sm:$0xf]  ;;  %v3316_v63 = vld [vmem:[#allocation2 + $0x50] sm:$0xf0]  ;;  %v124_v2 = vld [vmem:[%s5799_s0 + $0x48] sm:$0xff] }
  0x84   :  { %v310_v8 = vmul.f32 0.0625, %v266_v3  ;;  %v320_v11 = vpack.c.bf16 %v300_v43, %v300_v43  ;;  %v4371_v12 = vor.u32 %v4994_v29, %v4370_v20  ;;  %v712_v13 = vsel %vm705_vm0, %v701_v30, %v691_v61  ;;  %v123_v16 = vld [vmem:[%s5799_s0 + $0x40] sm:$0xff]  ;;  %v133_v20 = vld [vmem:[%s5799_s0 + $0x90] sm:$0xff]  ;;  %v134_v3 = vld [vmem:[%s5799_s0 + $0x98] sm:$0xff] }
  0x85   :  { %v689_v14 = vunpack.c.l.b16 %v319_v5  ;;  %v699_v41 = vunpack.c.l.b16 %v329_v6  ;;  %v692_v44 = vunpack.c.l.b16 %v322_v34  ;;  %v5673_v42 = vpack.c.b16 %v712_v13, %v712_v13  ;;  %v4760_v0 = vld [vmem:[#allocation2 + $0x144] sm:$0xf]  ;;  %v3444_v36 = vld [vmem:[#allocation2 + $0x150] sm:$0xf0]  ;;  %v4322_v43 = vld [vmem:[#allocation2 + $0x820] sm:$0xf] }
  0x86   :  { %v702_v45 = vunpack.c.l.b16 %v332_v7  ;;  %v330_v23 = vpack.c.bf16 %v310_v8, %v310_v8  ;;  %v690_v18 = vunpack.c.l.b16 %v320_v11  ;;  %2443 = vmatpush.bf16.msra.mxu0 %v4371_v12  ;;  %v4499_v25 = vor.u32 %v5026_v32, %v4498_v46  ;;  %v143_v29 = vld [vmem:[%s5799_s0 + $0xe0] sm:$0xff]  ;;  %v153_v61 = vld [vmem:[%s5799_s0 + $0x130] sm:$0xff]  ;;  %v144_v30 = vld [vmem:[%s5799_s0 + $0xe8] sm:$0xff] }
  0x87   :  { %v710_v24 = vsel %vm705_vm0, %v699_v41, %v689_v14  ;;  %v3351_v54 = vor.u32 %v4736_v22, %v3348_v38  ;;  %v3479_v51 = vor.u32 %v4768_v35, %v3476_v40  ;;  %2422 = vmatmul.bf16.vlgmr.msrb.gmra.mxu2 %v5673_v42  ;;  %v4355_v49 = vor.u32 %v4990_v17, %v4354_v15  ;;  %v4982_v46 = vld [vmem:[#allocation2 + $0x82c] sm:$0xf0]  ;;  %v4450_v6 = vld [vmem:[#allocation2 + $0x920] sm:$0xf]  ;;  %v154_v32 = vld [vmem:[%s5799_s0 + $0x138] sm:$0xff]  ;;  %s5282_s0 = smov [#allocation13]  }
  0x88   :  { %v5677_v53 = vpack.c.b16 %v710_v24, %v710_v24  ;;  %v713_v31 = vsel %vm705_vm0, %v702_v45, %v692_v44  ;;  %v700_v56 = vunpack.c.l.b16 %v330_v23  ;;  %2456 = vmatpush.bf16.msra.mxu1 %v4499_v25  ;;  %v3335_v58 = vor.u32 %v4732_v47, %v3332_v48  ;;  %v5014_v34 = vld [vmem:[#allocation2 + $0x92c] sm:$0xf0]  ;;  %v4724_v7 = vld [vmem:[#allocation2 + $0x24] sm:$0xf]  ;;  %v3300_v8 = vld [vmem:[#allocation2 + $0x30] sm:$0xf0] }
  0x89   :  { %v5680_v57 = vpack.c.b16 %v713_v31, %v713_v31  ;;  %2469 = vmatpush.bf16.msra.mxu2 %v3351_v54  ;;  %2482 = vmatpush.bf16.msra.mxu3 %v3479_v51  ;;  %v4483_v59 = vor.u32 %v5022_v52, %v4482_v19  ;;  %v3463_v60 = vor.u32 %v4764_v26, %v3460_v55  ;;  %v4756_v11 = vld [vmem:[#allocation2 + $0x124] sm:$0xf]  ;;  %v3428_v35 = vld [vmem:[#allocation2 + $0x130] sm:$0xf0]  ;;  %v4306_v40 = vld [vmem:[#allocation2 + $0x800] sm:$0xf] }
  0x8a   :  { %2396 = vmatmul.bf16.vlgmr.msrb.gmra.mxu0 %v5677_v53  ;;  %v711_v9 = vsel %vm705_vm0, %v700_v56, %v690_v18  ;;  %v4339_v21 = vor.u32 %v4986_v50, %v4338_v27  ;;  %v3319_v5 = vor.u32 %v4728_v62, %v3316_v63  ;;  %v4467_v22 = vor.u32 %v5018_v33, %v4466_v4  ;;  %v4978_v13 = vld [vmem:[#allocation2 + $0x80c] sm:$0xf0]  ;;  %v5712_v41 = vld [vmem:[#allocation2 + $0x900] sm:$0xf]  ;;  %v4720_v15 = vld [vmem:[#allocation2 + $0x4] sm:$0xf] }
  0x8b   :  { %2435 = vmatmul.bf16.vlgmr.msrb.gmra.mxu3 %v5680_v57  ;;  %v5691_v39 = vpack.c.b16 %v711_v9, %v711_v9  ;;  %2444 = vmatpush.bf16.msra.mxu0 %v4355_v49  ;;  %v3447_v38 = vor.u32 %v4760_v0, %v3444_v36  ;;  %v4323_v12 = vor.u32 %v4982_v46, %v4322_v43  ;;  %v5714_v44 = vld [vmem:[#allocation2 + $0x90c] sm:$0xf0]  ;;  %v3284_v17 = vld [vmem:[#allocation2 + $0x10] sm:$0xf0]  ;;  %v4752_v48 = vld [vmem:[#allocation2 + $0x104] sm:$0xf] }
  0x8c   :  { %2457 = vmatpush.bf16.msra.mxu1 %v4483_v59  ;;  %v211_v14 = vadd.f32 %v133_v20, %v123_v16  ;;  %v281_v45 = vadd.f32 %v153_v61, %v143_v29  ;;  %v218_v23 = vadd.f32 %v134_v3, %v124_v2  ;;  %v288_v18 = vadd.f32 %v154_v32, %v144_v30  ;;  %v3412_v24 = vld [vmem:[#allocation2 + $0x110] sm:$0xf0]  ;;  %v4812_v25 = vld [vmem:[#allocation2 + $0x2e4] sm:$0xf]  ;;  %s3265_s25 = sshll.u32 %s5282_s0, 4  ;;  %s3266_s25 = int_to_ptr.vmem [resolvable:$true] %s3265_s25 }
  0x8d   :  { %2409 = vmatmul.bf16.vlgmr.msrb.gmra.mxu1 %v5691_v39  ;;  %2470 = vmatpush.bf16.msra.mxu2 %v3335_v58  ;;  %v4451_v19 = vor.u32 %v5014_v34, %v4450_v6  ;;  %v3303_v47 = vor.u32 %v4724_v7, %v3300_v8  ;;  %v3652_v54 = vld [vmem:[#allocation2 + $0x2f0] sm:$0xf0]  ;;  %v3431_v52 = vor.u32 %v4756_v11, %v3428_v35  ;;  %v4844_v26 = vld [vmem:[#allocation2 + $0x3e4] sm:$0xf] }
  0x8e   :  { %2483 = vmatpush.bf16.msra.mxu3 %v3463_v60  ;;  %v212_v51 = vrot.slane %v211_v14, 4  ;;  %v282_v55 = vrot.slane %v281_v45, 4  ;;  %v219_v31 = vrot.slane %v218_v23, 4  ;;  %v289_v56 = vrot.slane %v288_v18, 4  ;;  %v3780_v27 = vld [vmem:[#allocation2 + $0x3f0] sm:$0xf0] }
  0x8f   :  { %2445 = vmatpush.bf16.msra.mxu0 %v4339_v21  ;;  %v4307_v49 = vor.u32 %v4978_v13, %v4306_v40  ;;  %v4876_v50 = vld [vmem:[#allocation2 + $0x4e4] sm:$0xf]  ;;  %v3908_v58 = vld [vmem:[#allocation2 + $0x4f0] sm:$0xf0]  ;;  %v3655_v9 = vor.u32 %v4812_v25, %v3652_v54  ;;  %v4435_v20 = vor.u32 %v5714_v44, %v5712_v41  ;;  %v3287_v21 = vor.u32 %v4720_v15, %v3284_v17 }
  0x90   :  { %2458 = vmatpush.bf16.msra.mxu1 %v4467_v22  ;;  %v213_v4 = vadd.f32 %v212_v51, %v211_v14  ;;  %v4908_v59 = vld [vmem:[#allocation2 + $0x5e4] sm:$0xf]  ;;  %v4036_v60 = vld [vmem:[#allocation2 + $0x5f0] sm:$0xf0]  ;;  %v283_v33 = vadd.f32 %v282_v55, %v281_v45  ;;  %v220_v62 = vadd.f32 %v219_v31, %v218_v23  ;;  %v290_v63 = vadd.f32 %v289_v56, %v288_v18 }
  0x91   :  { %2471 = vmatpush.bf16.msra.mxu2 %v3319_v5  ;;  %v4808_v16 = vld [vmem:[#allocation2 + $0x2c4] sm:$0xf]  ;;  %v3636_v36 = vld [vmem:[#allocation2 + $0x2d0] sm:$0xf0]  ;;  %v3415_v61 = vor.u32 %v4752_v48, %v3412_v24  ;;  %v3783_v30 = vor.u32 %v4844_v26, %v3780_v27  ;;  %v3911_v5 = vor.u32 %v4876_v50, %v3908_v58  ;;  %v4039_v6 = vor.u32 %v4908_v59, %v4036_v60 }
  0x92   :  { %2484 = vmatpush.bf16.msra.mxu3 %v3447_v38  ;;  %v214_v0 = vrot.slane %v213_v4, 2  ;;  %v4840_v29 = vld [vmem:[#allocation2 + $0x3c4] sm:$0xf]  ;;  %v284_v2 = vrot.slane %v283_v33, 2  ;;  %v221_v3 = vrot.slane %v220_v62, 2  ;;  %v291_v43 = vrot.slane %v290_v63, 2 }
  0x93   :  { %2446 = vmatpush.bf16.msra.mxu0 %v4323_v12  ;;  %v3764_v46 = vld [vmem:[#allocation2 + $0x3d0] sm:$0xf0]  ;;  %v4872_v32 = vld [vmem:[#allocation2 + $0x4c4] sm:$0xf]  ;;  %v3639_v12 = vor.u32 %v4808_v16, %v3636_v36 }
  0x94   :  { %2459 = vmatpush.bf16.msra.mxu1 %v4451_v19  ;;  %v215_v34 = vadd.f32 %v214_v0, %v213_v4  ;;  %v3892_v22 = vld [vmem:[#allocation2 + $0x4d0] sm:$0xf0]  ;;  %v4904_v38 = vld [vmem:[#allocation2 + $0x5c4] sm:$0xf]  ;;  %v285_v7 = vadd.f32 %v284_v2, %v283_v33  ;;  %v222_v8 = vadd.f32 %v221_v3, %v220_v62  ;;  %v292_v11 = vadd.f32 %v291_v43, %v290_v63 }
  0x95   :  { %2472 = vmatpush.bf16.msra.mxu2 %v3303_v47  ;;  %v4020_v35 = vld [vmem:[#allocation2 + $0x5d0] sm:$0xf0]  ;;  %v4804_v40 = vld [vmem:[#allocation2 + $0x2a4] sm:$0xf]  ;;  %v3767_v41 = vor.u32 %v4840_v29, %v3764_v46  ;;  %v3895_v23 = vor.u32 %v4872_v32, %v3892_v22 }
  0x96   :  { %2485 = vmatpush.bf16.msra.mxu3 %v3431_v52  ;;  %v3620_v13 = vld [vmem:[#allocation2 + $0x2b0] sm:$0xf0]  ;;  %v216_v14 = vrot.slane %v215_v34, 1  ;;  %v4836_v44 = vld [vmem:[#allocation2 + $0x3a4] sm:$0xf]  ;;  %v286_v15 = vrot.slane %v285_v7, 1  ;;  %v4023_v47 = vor.u32 %v4904_v38, %v4020_v35 }
  0x97   :  { %2447 = vmatpush.bf16.msra.mxu0 %v4307_v49  ;;  %v223_v17 = vrot.slane %v222_v8, 1  ;;  %v293_v45 = vrot.slane %v292_v11, 1  ;;  %v3748_v18 = vld [vmem:[#allocation2 + $0x3b0] sm:$0xf0]  ;;  %v3623_v48 = vor.u32 %v4804_v40, %v3620_v13  ;;  %v4868_v24 = vld [vmem:[#allocation2 + $0x4a4] sm:$0xf] }
  0x98   :  { %2460 = vmatpush.bf16.msra.mxu1 %v4435_v20  ;;  %v217_v19 = vadd.f32 %v216_v14, %v215_v34  ;;  %v3876_v25 = vld [vmem:[#allocation2 + $0x4b0] sm:$0xf0]  ;;  %v4900_v54 = vld [vmem:[#allocation2 + $0x5a4] sm:$0xf]  ;;  %v287_v51 = vadd.f32 %v286_v15, %v285_v7  ;;  %v3751_v27 = vor.u32 %v4836_v44, %v3748_v18 }
  0x99   :  { %2473 = vmatpush.bf16.msra.mxu2 %v3287_v21  ;;  %v224_v52 = vadd.f32 %v223_v17, %v222_v8  ;;  %v294_v26 = vadd.f32 %v293_v45, %v292_v11  ;;  %v4004_v55 = vld [vmem:[#allocation2 + $0x5b0] sm:$0xf0]  ;;  %v4800_v31 = vld [vmem:[#allocation2 + $0x284] sm:$0xf] }
  0x9a   :  { %2486 = vmatpush.bf16.msra.mxu3 %v3415_v61  ;;  %v3604_v56 = vld [vmem:[#allocation2 + $0x290] sm:$0xf0]  ;;  %v303_v49 = vmul.f32 0.0625, %v217_v19  ;;  %v313_v50 = vmul.f32 0.0625, %v287_v51  ;;  %v4007_v60 = vor.u32 %v4900_v54, %v4004_v55  ;;  %v4832_v20 = vld [vmem:[#allocation2 + $0x384] sm:$0xf] }
  0x9b   :  { %2492 = vmatpush.bf16.msrb.mxu0 %v3655_v9  ;;  %v304_v58 = vmul.f32 0.0625, %v224_v52  ;;  %v314_v4 = vmul.f32 0.0625, %v294_v26  ;;  %v3879_v9 = vor.u32 %v4868_v24, %v3876_v25  ;;  %v3607_v33 = vor.u32 %v4800_v31, %v3604_v56  ;;  %v3732_v21 = vld [vmem:[#allocation2 + $0x390] sm:$0xf0]  ;;  %v4864_v36 = vld [vmem:[#allocation2 + $0x484] sm:$0xf] }
  0x9c   :  { %2505 = vmatpush.bf16.msrb.mxu1 %v3783_v30  ;;  %2474 = vmatmul.bf16.vlgmr.msra.gmra.mxu2 %v5585_v10  ;;  %v323_v59 = vpack.c.bf16 %v303_v49, %v303_v49  ;;  %v333_v62 = vpack.c.bf16 %v313_v50, %v313_v50  ;;  %v3860_v29 = vld [vmem:[#allocation2 + $0x490] sm:$0xf0]  ;;  %v4896_v61 = vld [vmem:[#allocation2 + $0x584] sm:$0xf] }
  0x9d   :  { %2518 = vmatpush.bf16.msrb.mxu2 %v3911_v5  ;;  %2487 = vmatmul.bf16.vlgmr.msra.gmra.mxu3 %v5662_v28  ;;  %v324_v63 = vpack.c.bf16 %v304_v58, %v304_v58  ;;  %v334_v16 = vpack.c.bf16 %v314_v4, %v314_v4  ;;  %v3988_v46 = vld [vmem:[#allocation2 + $0x590] sm:$0xf0]  ;;  %v4796_v30 = vld [vmem:[#allocation2 + $0x264] sm:$0xf]  ;;  %v3863_v22 = vor.u32 %v4864_v36, %v3860_v29 }
  0x9e   :  { %2531 = vmatpush.bf16.msrb.mxu3 %v4039_v6  ;;  %v693_v0 = vunpack.c.l.b16 %v323_v59  ;;  %v703_v2 = vunpack.c.l.b16 %v333_v62  ;;  %v3588_v5 = vld [vmem:[#allocation2 + $0x270] sm:$0xf0]  ;;  %v3735_v6 = vor.u32 %v4832_v20, %v3732_v21  ;;  %v4828_v38 = vld [vmem:[#allocation2 + $0x364] sm:$0xf] }
  0x9f   :  { %2493 = vmatpush.bf16.msrb.mxu0 %v3639_v12  ;;  %v694_v3 = vunpack.c.l.b16 %v324_v63  ;;  %v704_v43 = vunpack.c.l.b16 %v334_v16  ;;  %v3716_v7 = vld [vmem:[#allocation2 + $0x370] sm:$0xf0]  ;;  %v3991_v12 = vor.u32 %v4896_v61, %v3988_v46  ;;  %v3591_v35 = vor.u32 %v4796_v30, %v3588_v5  ;;  %v4860_v40 = vld [vmem:[#allocation2 + $0x464] sm:$0xf] }
  0xa0   :  { %2506 = vmatpush.bf16.msrb.mxu1 %v3767_v41  ;;  %v714_v34 = vsel %vm705_vm0, %v703_v2, %v693_v0  ;;  %v3844_v13 = vld [vmem:[#allocation2 + $0x470] sm:$0xf0]  ;;  %v4892_v14 = vld [vmem:[#allocation2 + $0x564] sm:$0xf]  ;;  %v3719_v17 = vor.u32 %v4828_v38, %v3716_v7 }
  0xa1   :  { %2519 = vmatpush.bf16.msrb.mxu2 %v3895_v23  ;;  %v715_v32 = vsel %vm705_vm0, %v704_v43, %v694_v3  ;;  %v5722_v8 = vpack.c.b16 %v714_v34, %v714_v34  ;;  %v3972_v41 = vld [vmem:[#allocation2 + $0x570] sm:$0xf0]  ;;  %v4792_v44 = vld [vmem:[#allocation2 + $0x244] sm:$0xf]  ;;  %v3847_v45 = vor.u32 %v4860_v40, %v3844_v13 }
  0xa2   :  { %2532 = vmatpush.bf16.msrb.mxu3 %v4023_v47  ;;  %v5724_v11 = vpack.c.b16 %v715_v32, %v715_v32  ;;  %v3572_v15 = vld [vmem:[#allocation2 + $0x250] sm:$0xf0]  ;;  %v4824_v23 = vld [vmem:[#allocation2 + $0x344] sm:$0xf]  ;;  %v3975_v19 = vor.u32 %v4892_v14, %v3972_v41 }
  0xa3   :  { %2494 = vmatpush.bf16.msrb.mxu0 %v3623_v48  ;;  %v3700_v18 = vld [vmem:[#allocation2 + $0x350] sm:$0xf0]  ;;  %v3575_v47 = vor.u32 %v4792_v44, %v3572_v15  ;;  %v4856_v48 = vld [vmem:[#allocation2 + $0x444] sm:$0xf] }
  0xa4   :  { %2507 = vmatpush.bf16.msrb.mxu1 %v3751_v27  ;;  %2448 = vmatmul.bf16.vlgmr.msra.gmra.mxu0 %v5722_v8  ;;  %v3828_v24 = vld [vmem:[#allocation2 + $0x450] sm:$0xf0]  ;;  %v4888_v25 = vld [vmem:[#allocation2 + $0x544] sm:$0xf]  ;;  %v3703_v55 = vor.u32 %v4824_v23, %v3700_v18 }
  0xa5   :  { %2520 = vmatpush.bf16.msrb.mxu2 %v3879_v9  ;;  %2461 = vmatmul.bf16.vlgmr.msra.gmra.mxu1 %v5724_v11  ;;  %v3956_v54 = vld [vmem:[#allocation2 + $0x550] sm:$0xf0]  ;;  %v4788_v51 = vld [vmem:[#allocation2 + $0x224] sm:$0xf]  ;;  %v3831_v31 = vor.u32 %v4856_v48, %v3828_v24 }
  0xa6   :  { %2533 = vmatpush.bf16.msrb.mxu3 %v4007_v60  ;;  %v3556_v52 = vld [vmem:[#allocation2 + $0x230] sm:$0xf0]  ;;  %v4820_v26 = vld [vmem:[#allocation2 + $0x324] sm:$0xf]  ;;  %v3959_v49 = vor.u32 %v4888_v25, %v3956_v54 }
  0xa7   :  { %2495 = vmatpush.bf16.msrb.mxu0 %v3607_v33  ;;  %v3684_v56 = vld [vmem:[#allocation2 + $0x330] sm:$0xf0]  ;;  %v3559_v27 = vor.u32 %v4788_v51, %v3556_v52  ;;  %v4852_v50 = vld [vmem:[#allocation2 + $0x424] sm:$0xf] }
  0xa8   :  { %2508 = vmatpush.bf16.msrb.mxu1 %v3735_v6  ;;  %v3812_v58 = vld [vmem:[#allocation2 + $0x430] sm:$0xf0]  ;;  %v4884_v4 = vld [vmem:[#allocation2 + $0x524] sm:$0xf]  ;;  %v3687_v63 = vor.u32 %v4820_v26, %v3684_v56 }
  0xa9   :  { %2521 = vmatpush.bf16.msrb.mxu2 %v3863_v22  ;;  %v3940_v9 = vld [vmem:[#allocation2 + $0x530] sm:$0xf0]  ;;  %v4784_v59 = vld [vmem:[#allocation2 + $0x204] sm:$0xf]  ;;  %v3815_v16 = vor.u32 %v4852_v50, %v3812_v58 }
  0xaa   :  { %2534 = vmatpush.bf16.msrb.mxu3 %v3991_v12  ;;  %v3540_v60 = vld [vmem:[#allocation2 + $0x210] sm:$0xf0]  ;;  %v4940_v33 = vld [vmem:[#allocation2 + $0x6e4] sm:$0xf]  ;;  %v3943_v36 = vor.u32 %v4884_v4, %v3940_v9 }
  0xab   :  { %2496 = vmatpush.bf16.msrb.mxu0 %v3591_v35  ;;  %v4164_v62 = vld [vmem:[#allocation2 + $0x6f0] sm:$0xf0]  ;;  %v4816_v20 = vld [vmem:[#allocation2 + $0x304] sm:$0xf]  ;;  %v3543_v29 = vor.u32 %v4784_v59, %v3540_v60 }
  0xac   :  { %2509 = vmatpush.bf16.msrb.mxu1 %v3719_v17  ;;  %v3668_v21 = vld [vmem:[#allocation2 + $0x310] sm:$0xf0]  ;;  %v4848_v0 = vld [vmem:[#allocation2 + $0x404] sm:$0xf]  ;;  %v4167_v43 = vor.u32 %v4940_v33, %v4164_v62 }
  0xad   :  { %2522 = vmatpush.bf16.msrb.mxu2 %v3847_v45  ;;  %v3796_v61 = vld [vmem:[#allocation2 + $0x410] sm:$0xf0]  ;;  %v4880_v2 = vld [vmem:[#allocation2 + $0x504] sm:$0xf]  ;;  %v3671_v22 = vor.u32 %v4816_v20, %v3668_v21 }
  0xae   :  { %2535 = vmatpush.bf16.msrb.mxu3 %v3975_v19  ;;  %v3924_v3 = vld [vmem:[#allocation2 + $0x510] sm:$0xf0]  ;;  %v4972_v46 = vld [vmem:[#allocation2 + $0x7e4] sm:$0xf]  ;;  %v3799_v38 = vor.u32 %v4848_v0, %v3796_v61 }
  0xaf   :  { %2497 = vmatpush.bf16.msrb.mxu0 %v3575_v47  ;;  %v4292_v30 = vld [vmem:[#allocation2 + $0x7f0] sm:$0xf0]  ;;  %v5004_v5 = vld [vmem:[#allocation2 + $0x8e4] sm:$0xf]  ;;  %v3927_v35 = vor.u32 %v4880_v2, %v3924_v3 }
  0xb0   :  { %2510 = vmatpush.bf16.msrb.mxu1 %v3703_v55  ;;  %v4420_v6 = vld [vmem:[#allocation2 + $0x8f0] sm:$0xf0]  ;;  %v5036_v34 = vld [vmem:[#allocation2 + $0x9e4] sm:$0xf]  ;;  %v4295_v40 = vor.u32 %v4972_v46, %v4292_v30 }
  0xb1   :  { %2523 = vmatpush.bf16.msrb.mxu2 %v3831_v31  ;;  %v4548_v32 = vld [vmem:[#allocation2 + $0x9f0] sm:$0xf0]  ;;  %v4936_v7 = vld [vmem:[#allocation2 + $0x6c4] sm:$0xf]  ;;  %v4423_v13 = vor.u32 %v5004_v5, %v4420_v6 }
  0xb2   :  { %2536 = vmatpush.bf16.msrb.mxu3 %v3959_v49  ;;  %v4148_v12 = vld [vmem:[#allocation2 + $0x6d0] sm:$0xf0]  ;;  %v4551_v14 = vor.u32 %v5036_v34, %v4548_v32  ;;  %v4968_v41 = vld [vmem:[#allocation2 + $0x7c4] sm:$0xf] }
  0xb3   :  { %2498 = vmatpush.bf16.msrb.mxu0 %v3559_v27  ;;  %v4276_v44 = vld [vmem:[#allocation2 + $0x7d0] sm:$0xf0]  ;;  %v5000_v15 = vld [vmem:[#allocation2 + $0x8c4] sm:$0xf]  ;;  %v4151_v17 = vor.u32 %v4936_v7, %v4148_v12 }
  0xb4   :  { %2511 = vmatpush.bf16.msrb.mxu1 %v3687_v63  ;;  %v4404_v45 = vld [vmem:[#allocation2 + $0x8d0] sm:$0xf0]  ;;  %v5032_v23 = vld [vmem:[#allocation2 + $0x9c4] sm:$0xf]  ;;  %v4279_v48 = vor.u32 %v4968_v41, %v4276_v44 }
  0xb5   :  { %2524 = vmatpush.bf16.msrb.mxu2 %v3815_v16  ;;  %v4532_v18 = vld [vmem:[#allocation2 + $0x9d0] sm:$0xf0]  ;;  %v4932_v19 = vld [vmem:[#allocation2 + $0x6a4] sm:$0xf]  ;;  %v4407_v24 = vor.u32 %v5000_v15, %v4404_v45 }
  0xb6   :  { %2537 = vmatpush.bf16.msrb.mxu3 %v3943_v36  ;;  %v4132_v47 = vld [vmem:[#allocation2 + $0x6b0] sm:$0xf0]  ;;  %v4535_v25 = vor.u32 %v5032_v23, %v4532_v18  ;;  %v4964_v54 = vld [vmem:[#allocation2 + $0x7a4] sm:$0xf] }
  0xb7   :  { %2499 = vmatpush.bf16.msrb.mxu0 %v3543_v29  ;;  %v4260_v51 = vld [vmem:[#allocation2 + $0x7b0] sm:$0xf0]  ;;  %v4996_v52 = vld [vmem:[#allocation2 + $0x8a4] sm:$0xf]  ;;  %v4135_v26 = vor.u32 %v4932_v19, %v4132_v47 }
  0xb8   :  { %2512 = vmatpush.bf16.msrb.mxu1 %v3671_v22  ;;  %v4388_v55 = vld [vmem:[#allocation2 + $0x8b0] sm:$0xf0]  ;;  %v5028_v31 = vld [vmem:[#allocation2 + $0x9a4] sm:$0xf]  ;;  %v4263_v50 = vor.u32 %v4964_v54, %v4260_v51 }
  0xb9   :  { %2525 = vmatpush.bf16.msrb.mxu2 %v3799_v38  ;;  %v4516_v56 = vld [vmem:[#allocation2 + $0x9b0] sm:$0xf0]  ;;  %v4928_v49 = vld [vmem:[#allocation2 + $0x684] sm:$0xf]  ;;  %v4391_v58 = vor.u32 %v4996_v52, %v4388_v55 }
  0xba   :  { %2538 = vmatpush.bf16.msrb.mxu3 %v3927_v35  ;;  %2500 = vmatmul.bf16.vlgmr.msrb.gmra.mxu0 %v5574_v1  ;;  %v4116_v27 = vld [vmem:[#allocation2 + $0x690] sm:$0xf0]  ;;  %v4519_v4 = vor.u32 %v5028_v31, %v4516_v56  ;;  %v4960_v9 = vld [vmem:[#allocation2 + $0x784] sm:$0xf]  ;;  %v3402_v31 = vld [vmem:[#allocation2 + $0xe8] sm:$0xf] }
  0xbb   :  { %2544 = vmatpush.bf16.msra.mxu0 %v4167_v43  ;;  %v4244_v59 = vld [vmem:[#allocation2 + $0x790] sm:$0xf0]  ;;  %v4992_v60 = vld [vmem:[#allocation2 + $0x884] sm:$0xf]  ;;  %2513 = vmatmul.bf16.vlgmr.msrb.gmra.mxu1 %v5610_v37  ;;  %v4119_v33 = vor.u32 %v4928_v49, %v4116_v27  ;;  %v4751_v56 = vld [vmem:[#allocation2 + $0xf4] sm:$0xf0] }
  0xbc   :  { %2557 = vmatpush.bf16.msra.mxu1 %v4295_v40  ;;  %2526 = vmatmul.bf16.vlgmr.msrb.gmra.mxu2 %v5677_v53  ;;  %v4372_v62 = vld [vmem:[#allocation2 + $0x890] sm:$0xf0]  ;;  %v5024_v63 = vld [vmem:[#allocation2 + $0x984] sm:$0xf]  ;;  %v4247_v0 = vor.u32 %v4960_v9, %v4244_v59 }
  0xbd   :  { %2570 = vmatpush.bf16.msra.mxu2 %v4423_v13  ;;  %2539 = vmatmul.bf16.vlgmr.msrb.gmra.mxu3 %v5691_v39  ;;  %v4500_v16 = vld [vmem:[#allocation2 + $0x990] sm:$0xf0]  ;;  %v4924_v20 = vld [vmem:[#allocation2 + $0x664] sm:$0xf]  ;;  %v4375_v36 = vor.u32 %v4992_v60, %v4372_v62  ;;  %v3403_v62 = vor.u32 %v4751_v56, %v3402_v31  ;;  %v4835_v31 = vld [vmem:[#allocation2 + $0x394] sm:$0xf0] }
  0xbe   :  { %2583 = vmatpush.bf16.msra.mxu3 %v4551_v14  ;;  %v4100_v21 = vld [vmem:[#allocation2 + $0x670] sm:$0xf0]  ;;  %v4503_v29 = vor.u32 %v5024_v63, %v4500_v16  ;;  %v4956_v61 = vld [vmem:[#allocation2 + $0x764] sm:$0xf]  ;;  %v4783_v63 = vld [vmem:[#allocation2 + $0x1f4] sm:$0xf0] }
  0xbf   :  { %2545 = vmatpush.bf16.msra.mxu0 %v4151_v17  ;;  %v4228_v2 = vld [vmem:[#allocation2 + $0x770] sm:$0xf0]  ;;  %v4988_v3 = vld [vmem:[#allocation2 + $0x864] sm:$0xf]  ;;  %v4103_v43 = vor.u32 %v4924_v20, %v4100_v21  ;;  %v3658_v16 = vld [vmem:[#allocation2 + $0x2e8] sm:$0xf] }
  0xc0   :  { %2558 = vmatpush.bf16.msra.mxu1 %v4279_v48  ;;  %v4356_v46 = vld [vmem:[#allocation2 + $0x870] sm:$0xf0]  ;;  %v5020_v30 = vld [vmem:[#allocation2 + $0x964] sm:$0xf]  ;;  %v4231_v32 = vor.u32 %v4956_v61, %v4228_v2  ;;  %v4815_v20 = vld [vmem:[#allocation2 + $0x2f4] sm:$0xf0] }
  0xc1   :  { %2571 = vmatpush.bf16.msra.mxu2 %v4407_v24  ;;  %v4484_v5 = vld [vmem:[#allocation2 + $0x970] sm:$0xf0]  ;;  %v4920_v6 = vld [vmem:[#allocation2 + $0x644] sm:$0xf]  ;;  %v4359_v22 = vor.u32 %v4988_v3, %v4356_v46  ;;  %v3659_v3 = vor.u32 %v4815_v20, %v3658_v16  ;;  %v4747_v46 = vld [vmem:[#allocation2 + $0xd4] sm:$0xf0] }
  0xc2   :  { %2584 = vmatpush.bf16.msra.mxu3 %v4535_v25  ;;  %v4084_v34 = vld [vmem:[#allocation2 + $0x650] sm:$0xf0]  ;;  %v4487_v38 = vor.u32 %v5020_v30, %v4484_v5  ;;  %v4952_v7 = vld [vmem:[#allocation2 + $0x744] sm:$0xf]  ;;  %v3514_v30 = vld [vmem:[#allocation2 + $0x1c8] sm:$0xf] }
  0xc3   :  { %2546 = vmatpush.bf16.msra.mxu0 %v4135_v26  ;;  %v4212_v12 = vld [vmem:[#allocation2 + $0x750] sm:$0xf0]  ;;  %v4984_v35 = vld [vmem:[#allocation2 + $0x844] sm:$0xf]  ;;  %v4087_v40 = vor.u32 %v4920_v6, %v4084_v34  ;;  %v4779_v6 = vld [vmem:[#allocation2 + $0x1d4] sm:$0xf0] }
  0xc4   :  { %2559 = vmatpush.bf16.msra.mxu1 %v4263_v50  ;;  %v4340_v13 = vld [vmem:[#allocation2 + $0x850] sm:$0xf0]  ;;  %v5016_v14 = vld [vmem:[#allocation2 + $0x944] sm:$0xf]  ;;  %v4215_v17 = vor.u32 %v4952_v7, %v4212_v12  ;;  %v3642_v34 = vld [vmem:[#allocation2 + $0x2c8] sm:$0xf]  ;;  %v3515_v12 = vor.u32 %v4779_v6, %v3514_v30 }
  0xc5   :  { %2572 = vmatpush.bf16.msra.mxu2 %v4391_v58  ;;  %v4468_v41 = vld [vmem:[#allocation2 + $0x950] sm:$0xf0]  ;;  %v4916_v44 = vld [vmem:[#allocation2 + $0x624] sm:$0xf]  ;;  %v4343_v45 = vor.u32 %v4984_v35, %v4340_v13  ;;  %v4743_v13 = vld [vmem:[#allocation2 + $0xb4] sm:$0xf0] }
  0xc6   :  { %2585 = vmatpush.bf16.msra.mxu3 %v4519_v4  ;;  %v4068_v15 = vld [vmem:[#allocation2 + $0x630] sm:$0xf0]  ;;  %v4471_v23 = vor.u32 %v5016_v14, %v4468_v41  ;;  %v4948_v18 = vld [vmem:[#allocation2 + $0x724] sm:$0xf]  ;;  %v3498_v14 = vld [vmem:[#allocation2 + $0x1a8] sm:$0xf] }
  0xc7   :  { %2547 = vmatpush.bf16.msra.mxu0 %v4119_v33  ;;  %v4196_v19 = vld [vmem:[#allocation2 + $0x730] sm:$0xf0]  ;;  %v4980_v47 = vld [vmem:[#allocation2 + $0x824] sm:$0xf]  ;;  %v4071_v48 = vor.u32 %v4916_v44, %v4068_v15  ;;  %v3530_v33 = vld [vmem:[#allocation2 + $0x1e8] sm:$0xf] }
  0xc8   :  { %2560 = vmatpush.bf16.msra.mxu1 %v4247_v0  ;;  %v4324_v24 = vld [vmem:[#allocation2 + $0x830] sm:$0xf0]  ;;  %v5012_v25 = vld [vmem:[#allocation2 + $0x924] sm:$0xf]  ;;  %v4199_v26 = vor.u32 %v4948_v18, %v4196_v19  ;;  %v3786_v0 = vld [vmem:[#allocation2 + $0x3e8] sm:$0xf]  ;;  %v3531_v2 = vor.u32 %v4783_v63, %v3530_v33 }
  0xc9   :  { %2573 = vmatpush.bf16.msra.mxu2 %v4375_v36  ;;  %v4452_v54 = vld [vmem:[#allocation2 + $0x930] sm:$0xf0]  ;;  %v4912_v51 = vld [vmem:[#allocation2 + $0x604] sm:$0xf]  ;;  %v4327_v49 = vor.u32 %v4980_v47, %v4324_v24  ;;  %v4847_v36 = vld [vmem:[#allocation2 + $0x3f4] sm:$0xf0] }
  0xca   :  { %2586 = vmatpush.bf16.msra.mxu3 %v4503_v29  ;;  %v4052_v52 = vld [vmem:[#allocation2 + $0x610] sm:$0xf0]  ;;  %v4944_v55 = vld [vmem:[#allocation2 + $0x704] sm:$0xf]  ;;  %v4455_v27 = vor.u32 %v5012_v25, %v4452_v54  ;;  %v3787_v5 = vor.u32 %v4847_v36, %v3786_v0  ;;  %v4775_v44 = vld [vmem:[#allocation2 + $0x1b4] sm:$0xf0] }
  0xcb   :  { %2548 = vmatpush.bf16.msra.mxu0 %v4103_v43  ;;  %v4180_v50 = vld [vmem:[#allocation2 + $0x710] sm:$0xf0]  ;;  %v4976_v58 = vld [vmem:[#allocation2 + $0x804] sm:$0xf]  ;;  %v4055_v9 = vor.u32 %v4912_v51, %v4052_v52  ;;  %v3386_v43 = vld [vmem:[#allocation2 + $0xc8] sm:$0xf]  ;;  %v3499_v19 = vor.u32 %v4775_v44, %v3498_v14 }
  0xcc   :  { %2561 = vmatpush.bf16.msra.mxu1 %v4231_v32  ;;  %v4308_v4 = vld [vmem:[#allocation2 + $0x810] sm:$0xf0]  ;;  %v5008_v59 = vld [vmem:[#allocation2 + $0x904] sm:$0xf]  ;;  %v4183_v21 = vor.u32 %v4944_v55, %v4180_v50  ;;  %v4811_v32 = vld [vmem:[#allocation2 + $0x2d4] sm:$0xf0]  ;;  %v3387_v7 = vor.u32 %v4747_v46, %v3386_v43 }
  0xcd   :  { %2574 = vmatpush.bf16.msra.mxu2 %v4359_v22  ;;  %v4436_v60 = vld [vmem:[#allocation2 + $0x910] sm:$0xf0]  ;;  %v4311_v29 = vor.u32 %v4976_v58, %v4308_v4  ;;  %v3770_v22 = vld [vmem:[#allocation2 + $0x3c8] sm:$0xf]  ;;  %v3643_v35 = vor.u32 %v4811_v32, %v3642_v34  ;;  %v4739_v24 = vld [vmem:[#allocation2 + $0x94] sm:$0xf0] }
  0xce   :  { %2587 = vmatpush.bf16.msra.mxu3 %v4487_v38  ;;  %v4439_v61 = vor.u32 %v5008_v59, %v4436_v60  ;;  %v4843_v38 = vld [vmem:[#allocation2 + $0x3d4] sm:$0xf0]  ;;  %v3626_v15 = vld [vmem:[#allocation2 + $0x2a8] sm:$0xf] }
  0xcf   :  { %2549 = vmatpush.bf16.msra.mxu0 %v4087_v40  ;;  %v3370_v40 = vld [vmem:[#allocation2 + $0xa8] sm:$0xf]  ;;  %v3771_v41 = vor.u32 %v4843_v38, %v3770_v22  ;;  %v4771_v51 = vld [vmem:[#allocation2 + $0x194] sm:$0xf0] }
  0xd0   :  { %2562 = vmatpush.bf16.msra.mxu1 %v4215_v17  ;;  %v4807_v17 = vld [vmem:[#allocation2 + $0x2b4] sm:$0xf0]  ;;  %v3371_v18 = vor.u32 %v4743_v13, %v3370_v40  ;;  %v3482_v25 = vld [vmem:[#allocation2 + $0x188] sm:$0xf] }
  0xd1   :  { %2575 = vmatpush.bf16.msra.mxu2 %v4343_v45  ;;  %v3754_v45 = vld [vmem:[#allocation2 + $0x3a8] sm:$0xf]  ;;  %v3627_v47 = vor.u32 %v4807_v17, %v3626_v15  ;;  %v4735_v58 = vld [vmem:[#allocation2 + $0x74] sm:$0xf0] }
  0xd2   :  { %2588 = vmatpush.bf16.msra.mxu3 %v4471_v23  ;;  %v4839_v23 = vld [vmem:[#allocation2 + $0x3b4] sm:$0xf0]  ;;  %v3610_v52 = vld [vmem:[#allocation2 + $0x288] sm:$0xf] }
  0xd3   :  { %2550 = vmatpush.bf16.msra.mxu0 %v4071_v48  ;;  %v3354_v48 = vld [vmem:[#allocation2 + $0x88] sm:$0xf]  ;;  %v3755_v54 = vor.u32 %v4839_v23, %v3754_v45  ;;  %v4767_v59 = vld [vmem:[#allocation2 + $0x174] sm:$0xf0] }
  0xd4   :  { %2563 = vmatpush.bf16.msra.mxu1 %v4199_v26  ;;  %v4803_v26 = vld [vmem:[#allocation2 + $0x294] sm:$0xf0]  ;;  %v3738_v55 = vld [vmem:[#allocation2 + $0x388] sm:$0xf]  ;;  %v3355_v56 = vor.u32 %v4739_v24, %v3354_v48 }
  0xd5   :  { %2576 = vmatpush.bf16.msra.mxu2 %v4327_v49  ;;  %v3483_v49 = vor.u32 %v4771_v51, %v3482_v25  ;;  %v3338_v50 = vld [vmem:[#allocation2 + $0x68] sm:$0xf]  ;;  %v4799_v33 = vld [vmem:[#allocation2 + $0x274] sm:$0xf0] }
  0xd6   :  { %2589 = vmatpush.bf16.msra.mxu3 %v4455_v27  ;;  %v3611_v27 = vor.u32 %v4803_v26, %v3610_v52  ;;  %v3466_v4 = vld [vmem:[#allocation2 + $0x168] sm:$0xf]  ;;  %v4831_v63 = vld [vmem:[#allocation2 + $0x374] sm:$0xf0]  ;;  %v3339_v16 = vor.u32 %v4735_v58, %v3338_v50 }
  0xd7   :  { %2551 = vmatpush.bf16.msra.mxu0 %v4055_v9  ;;  %v3739_v9 = vor.u32 %v4835_v31, %v3738_v55  ;;  %v3594_v60 = vld [vmem:[#allocation2 + $0x268] sm:$0xf]  ;;  %v3467_v20 = vor.u32 %v4767_v59, %v3466_v4  ;;  %v4731_v36 = vld [vmem:[#allocation2 + $0x54] sm:$0xf0] }
  0xd8   :  { %2564 = vmatpush.bf16.msra.mxu1 %v4183_v21  ;;  %v3595_v21 = vor.u32 %v4799_v33, %v3594_v60  ;;  %v3322_v0 = vld [vmem:[#allocation2 + $0x48] sm:$0xf]  ;;  %v4795_v43 = vld [vmem:[#allocation2 + $0x254] sm:$0xf0] }
  0xd9   :  { %2577 = vmatpush.bf16.msra.mxu2 %v4311_v29  ;;  %v3450_v29 = vld [vmem:[#allocation2 + $0x148] sm:$0xf]  ;;  %v4827_v30 = vld [vmem:[#allocation2 + $0x354] sm:$0xf0] }
  0xda   :  { %2590 = vmatpush.bf16.msra.mxu3 %v4439_v61  ;;  %2552 = vmatmul.bf16.vlgmr.msra.gmra.mxu0 %v5673_v42  ;;  %v3706_v46 = vld [vmem:[#allocation2 + $0x348] sm:$0xf]  ;;  %v4727_v22 = vld [vmem:[#allocation2 + $0x34] sm:$0xf0] }
  0xdb   :  { %2596 = vmatpush.bf16.msrb.mxu0 %v3403_v62  ;;  %2565 = vmatmul.bf16.vlgmr.msra.gmra.mxu1 %v5680_v57  ;;  %v3722_v62 = vld [vmem:[#allocation2 + $0x368] sm:$0xf]  ;;  %v4791_v13 = vld [vmem:[#allocation2 + $0x234] sm:$0xf0] }
  0xdc   :  { %2609 = vmatpush.bf16.msrb.mxu1 %v3531_v2  ;;  %2578 = vmatmul.bf16.vlgmr.msra.gmra.mxu2 %v5722_v8  ;;  %v3723_v61 = vor.u32 %v4831_v63, %v3722_v62  ;;  %v4763_v2 = vld [vmem:[#allocation2 + $0x154] sm:$0xf0]  ;;  %v3306_v6 = vld [vmem:[#allocation2 + $0x28] sm:$0xf] }
  0xdd   :  { %2622 = vmatpush.bf16.msrb.mxu2 %v3659_v3  ;;  %2591 = vmatmul.bf16.vlgmr.msra.gmra.mxu3 %v5724_v11  ;;  %v3578_v3 = vld [vmem:[#allocation2 + $0x248] sm:$0xf]  ;;  %v3451_v34 = vor.u32 %v4763_v2, %v3450_v29  ;;  %v3307_v44 = vor.u32 %v4727_v22, %v3306_v6  ;;  %v4723_v17 = vld [vmem:[#allocation2 + $0x14] sm:$0xf0] }
  0xde   :  { %2635 = vmatpush.bf16.msrb.mxu3 %v3787_v5  ;;  %v3323_v5 = vor.u32 %v4731_v36, %v3322_v0  ;;  %v3579_v32 = vor.u32 %v4795_v43, %v3578_v3  ;;  %v3434_v38 = vld [vmem:[#allocation2 + $0x128] sm:$0xf]  ;;  %v4755_v48 = vld [vmem:[#allocation2 + $0x114] sm:$0xf0] }
  0xdf   :  { %2597 = vmatpush.bf16.msrb.mxu0 %v3387_v7  ;;  %v5736_v7 = vld [vmem:[#allocation5] sm:$0xf]  ;;  %v3562_v40 = vld [vmem:[#allocation2 + $0x228] sm:$0xf]  ;;  %v4819_v52 = vld [vmem:[#allocation2 + $0x314] sm:$0xf0] }
  0xe0   :  { %2610 = vmatpush.bf16.msrb.mxu1 %v3515_v12  ;;  %v3707_v12 = vor.u32 %v4827_v30, %v3706_v46  ;;  %v3690_v14 = vld [vmem:[#allocation2 + $0x328] sm:$0xf]  ;;  %v657_v45 = vperm.slane %v5736_v7, 0  ;;  %v4879_v55 = vld [vmem:[#allocation2 + $0x4f4] sm:$0xf0] }
  0xe1   :  { %2623 = vmatpush.bf16.msrb.mxu2 %v3643_v35  ;;  %v4759_v35 = vld [vmem:[#allocation2 + $0x134] sm:$0xf0]  ;;  %v3290_v15 = vld [vmem:[#allocation2 + $0x8] sm:$0xf] }
  0xe2   :  { %2636 = vmatpush.bf16.msrb.mxu3 %v3771_v41  ;;  %v4823_v41 = vld [vmem:[#allocation2 + $0x334] sm:$0xf0]  ;;  %v3546_v24 = vld [vmem:[#allocation2 + $0x208] sm:$0xf] }
  0xe3   :  { %2598 = vmatpush.bf16.msrb.mxu0 %v3371_v18  ;;  %v3435_v18 = vor.u32 %v4759_v35, %v3434_v38  ;;  %v3691_v25 = vor.u32 %v4823_v41, %v3690_v14  ;;  %v3674_v51 = vld [vmem:[#allocation2 + $0x308] sm:$0xf]  ;;  %v4943_v50 = vld [vmem:[#allocation2 + $0x6f4] sm:$0xf0] }
  0xe4   :  { %2611 = vmatpush.bf16.msrb.mxu1 %v3499_v19  ;;  %v3563_v19 = vor.u32 %v4791_v13, %v3562_v40  ;;  %v3914_v26 = vld [vmem:[#allocation2 + $0x4e8] sm:$0xf]  ;;  %v4975_v60 = vld [vmem:[#allocation2 + $0x7f4] sm:$0xf0]  ;;  %v3675_v62 = vor.u32 %v4819_v52, %v3674_v51 }
  0xe5   :  { %2624 = vmatpush.bf16.msrb.mxu2 %v3627_v47  ;;  %v3418_v47 = vld [vmem:[#allocation2 + $0x108] sm:$0xf]  ;;  %v3915_v63 = vor.u32 %v4879_v55, %v3914_v26  ;;  %v4875_v0 = vld [vmem:[#allocation2 + $0x4d4] sm:$0xf0] }
  0xe6   :  { %2637 = vmatpush.bf16.msrb.mxu3 %v3755_v54  ;;  %v4787_v54 = vld [vmem:[#allocation2 + $0x214] sm:$0xf0]  ;;  %v4042_v31 = vld [vmem:[#allocation2 + $0x5e8] sm:$0xf]  ;;  %v3419_v4 = vor.u32 %v4755_v48, %v3418_v47 }
  0xe7   :  { %2599 = vmatpush.bf16.msrb.mxu0 %v3355_v56  ;;  %v3291_v56 = vor.u32 %v4723_v17, %v3290_v15  ;;  %v4298_v59 = vld [vmem:[#allocation2 + $0x7e8] sm:$0xf]  ;;  %v4907_v2 = vld [vmem:[#allocation2 + $0x5d4] sm:$0xf0] }
  0xe8   :  { %2612 = vmatpush.bf16.msrb.mxu1 %v3483_v49  ;;  %v4911_v49 = vld [vmem:[#allocation2 + $0x5f4] sm:$0xf0]  ;;  %v4026_v36 = vld [vmem:[#allocation2 + $0x5c8] sm:$0xf] }
  0xe9   :  { %2625 = vmatpush.bf16.msrb.mxu2 %v3611_v27  ;;  %v4170_v27 = vld [vmem:[#allocation2 + $0x6e8] sm:$0xf]  ;;  %v4939_v43 = vld [vmem:[#allocation2 + $0x6d4] sm:$0xf0]  ;;  %v4027_v38 = vor.u32 %v4907_v2, %v4026_v36 }
  0xea   :  { %2638 = vmatpush.bf16.msrb.mxu3 %v3739_v9  ;;  %v3547_v9 = vor.u32 %v4787_v54, %v3546_v24  ;;  %v4154_v3 = vld [vmem:[#allocation2 + $0x6c8] sm:$0xf]  ;;  %v4871_v40 = vld [vmem:[#allocation2 + $0x4b4] sm:$0xf0] }
  0xeb   :  { %2600 = vmatpush.bf16.msrb.mxu0 %v3339_v16  ;;  %v4043_v16 = vor.u32 %v4911_v49, %v4042_v31  ;;  %v4282_v6 = vld [vmem:[#allocation2 + $0x7c8] sm:$0xf]  ;;  %v4903_v41 = vld [vmem:[#allocation2 + $0x5b4] sm:$0xf0] }
  0xec   :  { %2613 = vmatpush.bf16.msrb.mxu1 %v3467_v20  ;;  %v2345_v23 = vpop.f32.mrf.mxu0  ;;  %v4171_v20 = vor.u32 %v4943_v50, %v4170_v27  ;;  %v3882_v35 = vld [vmem:[#allocation2 + $0x4a8] sm:$0xf]  ;;  %v4935_v15 = vld [vmem:[#allocation2 + $0x6b4] sm:$0xf0] }
  0xed   :  { %2626 = vmatpush.bf16.msrb.mxu2 %v3595_v21  ;;  %v2346_v58 = vadd.f32 %v2345_v23, %v657_v45  ;;  %v3898_v21 = vld [vmem:[#allocation2 + $0x4c8] sm:$0xf]  ;;  %v4967_v23 = vld [vmem:[#allocation2 + $0x7b4] sm:$0xf0] }
  0xee   :  { %2639 = vmatpush.bf16.msrb.mxu3 %v3723_v61  ;;  %v4299_v61 = vor.u32 %v4975_v60, %v4298_v59  ;;  %v4010_v13 = vld [vmem:[#allocation2 + $0x5a8] sm:$0xf]  ;;  %v4899_v26 = vld [vmem:[#allocation2 + $0x594] sm:$0xf0] }
  0xef   :  { %2601 = vmatpush.bf16.msrb.mxu0 %v3323_v5  ;;  %v4266_v45 = vld [vmem:[#allocation2 + $0x7a8] sm:$0xf]  ;;  %v4011_v47 = vor.u32 %v4903_v41, %v4010_v13  ;;  %v4931_v31 = vld [vmem:[#allocation2 + $0x694] sm:$0xf0] }
  0xf0   :  { %2614 = vmatpush.bf16.msrb.mxu1 %v3451_v34  ;;  %v2371_v33 = vpop.f32.mrf.mxu2  ;;  %v4971_v34 = vld [vmem:[#allocation2 + $0x7d4] sm:$0xf0]  ;;  %v3866_v24 = vld [vmem:[#allocation2 + $0x488] sm:$0xf]  ;;  %v4267_v52 = vor.u32 %v4967_v23, %v4266_v45 }
  0xf1   :  { %2627 = vmatpush.bf16.msrb.mxu2 %v3579_v32  ;;  %v2358_v29 = vpop.f32.mrf.mxu1  ;;  %v3899_v32 = vor.u32 %v4875_v0, %v3898_v21  ;;  %v4283_v14 = vor.u32 %v4971_v34, %v4282_v6  ;;  %v3994_v54 = vld [vmem:[#allocation2 + $0x588] sm:$0xf]  ;;  %v4963_v27 = vld [vmem:[#allocation2 + $0x794] sm:$0xf0] }
  0xf2   :  { %2640 = vmatpush.bf16.msrb.mxu3 %v3707_v12  ;;  %v2359_v46 = vadd.f32 %v2358_v29, %v2346_v58  ;;  %v4155_v12 = vor.u32 %v4939_v43, %v4154_v3  ;;  %v4122_v55 = vld [vmem:[#allocation2 + $0x688] sm:$0xf]  ;;  %v3995_v58 = vor.u32 %v4899_v26, %v3994_v54  ;;  %v4863_v59 = vld [vmem:[#allocation2 + $0x474] sm:$0xf0] }
  0xf3   :  { %2602 = vmatpush.bf16.msrb.mxu0 %v3307_v44  ;;  %v2384_v30 = vpop.f32.mrf.mxu3  ;;  %v4138_v44 = vld [vmem:[#allocation2 + $0x6a8] sm:$0xf]  ;;  %v4959_v21 = vld [vmem:[#allocation2 + $0x774] sm:$0xf0] }
  0xf4   :  { %2615 = vmatpush.bf16.msrb.mxu1 %v3435_v18  ;;  %v2347_v5 = vpop.f32.mrf.mxu0  ;;  %v2372_v22 = vadd.f32 %v2371_v33, %v2359_v46  ;;  %v4139_v48 = vor.u32 %v4935_v15, %v4138_v44  ;;  %v4250_v49 = vld [vmem:[#allocation2 + $0x788] sm:$0xf]  ;;  %v4859_v2 = vld [vmem:[#allocation2 + $0x454] sm:$0xf0] }
  0xf5   :  { %2628 = vmatpush.bf16.msrb.mxu2 %v3563_v19  ;;  %v3883_v19 = vor.u32 %v4871_v40, %v3882_v35  ;;  %v3978_v60 = vld [vmem:[#allocation2 + $0x568] sm:$0xf]  ;;  %v4251_v33 = vor.u32 %v4963_v27, %v4250_v49  ;;  %v4891_v46 = vld [vmem:[#allocation2 + $0x554] sm:$0xf0] }
  0xf6   :  { %2641 = vmatpush.bf16.msrb.mxu3 %v3691_v25  ;;  %v5739_v17 = vadd.f32 %v2384_v30, %v2372_v22  ;;  %v4867_v25 = vld [vmem:[#allocation2 + $0x494] sm:$0xf0]  ;;  %v3962_v3 = vld [vmem:[#allocation2 + $0x548] sm:$0xf] }
  0xf7   :  { %2603 = vmatpush.bf16.msrb.mxu0 %v3291_v56  ;;  %v3867_v50 = vor.u32 %v4867_v25, %v3866_v24  ;;  %v4090_v30 = vld [vmem:[#allocation2 + $0x648] sm:$0xf]  ;;  %v4923_v5 = vld [vmem:[#allocation2 + $0x654] sm:$0xf0]  ;;  %v3963_v22 = vor.u32 %v4891_v46, %v3962_v3 }
  0xf8   :  { %2616 = vmatpush.bf16.msrb.mxu1 %v3419_v4  ;;  %v2373_v18 = vpop.f32.mrf.mxu2  ;;  %v4123_v4 = vor.u32 %v4931_v31, %v4122_v55  ;;  %v4218_v6 = vld [vmem:[#allocation2 + $0x748] sm:$0xf]  ;;  %v4955_v34 = vld [vmem:[#allocation2 + $0x754] sm:$0xf0] }
  0xf9   :  { %2629 = vmatpush.bf16.msrb.mxu2 %v3547_v9  ;;  %v2360_v51 = vpop.f32.mrf.mxu1  ;;  %v3850_v9 = vld [vmem:[#allocation2 + $0x468] sm:$0xf]  ;;  %v4855_v35 = vld [vmem:[#allocation2 + $0x434] sm:$0xf0]  ;;  %v4219_v13 = vor.u32 %v4955_v34, %v4218_v6 }
  0xfa   :  { %2642 = vmatpush.bf16.msrb.mxu3 %v3675_v62  ;;  %2604 = vmatmul.bf16.vlgmr.msrb.gmra.mxu0 %v5585_v10  ;;  %v4895_v62 = vld [vmem:[#allocation2 + $0x574] sm:$0xf0]  ;;  %v3851_v0 = vor.u32 %v4863_v59, %v3850_v9  ;;  %v3946_v40 = vld [vmem:[#allocation2 + $0x528] sm:$0xf] }
  0xfb   :  { %2648 = vmatpush.bf16.msra.mxu0 %v3915_v63  ;;  %2617 = vmatmul.bf16.vlgmr.msrb.gmra.mxu1 %v5662_v28  ;;  %v2386_v56 = vpop.f32.mrf.mxu3  ;;  %v4106_v63 = vld [vmem:[#allocation2 + $0x668] sm:$0xf]  ;;  %v3979_v36 = vor.u32 %v4895_v62, %v3978_v60  ;;  %v4919_v44 = vld [vmem:[#allocation2 + $0x634] sm:$0xf0]  ;;  %v4749_v60 = vld [vmem:[#allocation2 + $0xec] sm:$0xf] }
  0xfc   :  { %2661 = vmatpush.bf16.msra.mxu1 %v4043_v16  ;;  %2630 = vmatmul.bf16.vlgmr.msrb.gmra.mxu2 %v5574_v1  ;;  %v4927_v16 = vld [vmem:[#allocation2 + $0x674] sm:$0xf0]  ;;  %v4074_v41 = vld [vmem:[#allocation2 + $0x628] sm:$0xf] }
  0xfd   :  { %2674 = vmatpush.bf16.msra.mxu2 %v4171_v20  ;;  %2643 = vmatmul.bf16.vlgmr.msrb.gmra.mxu3 %v5610_v37  ;;  %v4234_v20 = vld [vmem:[#allocation2 + $0x768] sm:$0xf]  ;;  %v4107_v29 = vor.u32 %v4927_v16, %v4106_v63  ;;  %v4951_v23 = vld [vmem:[#allocation2 + $0x734] sm:$0xf0]  ;;  %v4075_v25 = vor.u32 %v4919_v44, %v4074_v41 }
  0xfe   :  { %2687 = vmatpush.bf16.msra.mxu3 %v4299_v61  ;;  %v3834_v61 = vld [vmem:[#allocation2 + $0x448] sm:$0xf]  ;;  %v4235_v43 = vor.u32 %v4959_v21, %v4234_v20  ;;  %v4883_v51 = vld [vmem:[#allocation2 + $0x514] sm:$0xf0]  ;;  %v4781_v20 = vld [vmem:[#allocation2 + $0x1ec] sm:$0xf] }
  0xff   :  { %2649 = vmatpush.bf16.msra.mxu0 %v3899_v32  ;;  %v3835_v32 = vor.u32 %v4859_v2, %v3834_v61  ;;  %v4202_v45 = vld [vmem:[#allocation2 + $0x728] sm:$0xf]  ;;  %v4915_v31 = vld [vmem:[#allocation2 + $0x614] sm:$0xf0]  ;;  %v3532_v21 = vld [vmem:[#allocation2 + $0x1f8] sm:$0xf0] }
 0x100   :  { %2662 = vmatpush.bf16.msra.mxu1 %v4027_v38  ;;  %v4091_v38 = vor.u32 %v4923_v5, %v4090_v30  ;;  %v3930_v54 = vld [vmem:[#allocation2 + $0x508] sm:$0xf]  ;;  %v4203_v55 = vor.u32 %v4951_v23, %v4202_v45  ;;  %v4947_v49 = vld [vmem:[#allocation2 + $0x714] sm:$0xf0]  ;;  %v3535_v6 = vor.u32 %v4781_v20, %v3532_v21  ;;  %v4733_v20 = vld [vmem:[#allocation2 + $0x6c] sm:$0xf] }
 0x101   :  { %2675 = vmatpush.bf16.msra.mxu2 %v4155_v12  ;;  %v3818_v12 = vld [vmem:[#allocation2 + $0x428] sm:$0xf]  ;;  %v5039_v59 = vld [vmem:[#allocation2 + $0x9f4] sm:$0xf0]  ;;  %v3931_v63 = vor.u32 %v4883_v51, %v3930_v54  ;;  %v3340_v21 = vld [vmem:[#allocation2 + $0x78] sm:$0xf0] }
 0x102   :  { %2688 = vmatpush.bf16.msra.mxu3 %v4283_v14  ;;  %v4887_v14 = vld [vmem:[#allocation2 + $0x534] sm:$0xf0]  ;;  %v4186_v56 = vld [vmem:[#allocation2 + $0x708] sm:$0xf] }
 0x103   :  { %2650 = vmatpush.bf16.msra.mxu0 %v3883_v19  ;;  %v3819_v19 = vor.u32 %v4855_v35, %v3818_v12  ;;  %v3947_v24 = vor.u32 %v4887_v14, %v3946_v40  ;;  %v4410_v46 = vld [vmem:[#allocation2 + $0x8c8] sm:$0xf]  ;;  %v5003_v30 = vld [vmem:[#allocation2 + $0x8d4] sm:$0xf0]  ;;  %v3516_v12 = vld [vmem:[#allocation2 + $0x1d8] sm:$0xf0] }
 0x104   :  { %2663 = vmatpush.bf16.msra.mxu1 %v4011_v47  ;;  %v3802_v47 = vld [vmem:[#allocation2 + $0x408] sm:$0xf]  ;;  %v5035_v34 = vld [vmem:[#allocation2 + $0x9d4] sm:$0xf0]  ;;  %v4411_v35 = vor.u32 %v5003_v30, %v4410_v46 }
 0x105   :  { %2676 = vmatpush.bf16.msra.mxu2 %v4139_v48  ;;  %v4851_v48 = vld [vmem:[#allocation2 + $0x414] sm:$0xf0]  ;;  %v4538_v5 = vld [vmem:[#allocation2 + $0x9c8] sm:$0xf] }
 0x106   :  { %2689 = vmatpush.bf16.msra.mxu3 %v4267_v52  ;;  %v4058_v52 = vld [vmem:[#allocation2 + $0x608] sm:$0xf]  ;;  %v3803_v9 = vor.u32 %v4851_v48, %v3802_v47  ;;  %v4999_v44 = vld [vmem:[#allocation2 + $0x8b4] sm:$0xf0]  ;;  %v3372_v47 = vld [vmem:[#allocation2 + $0xb8] sm:$0xf0] }
 0x107   :  { %2651 = vmatpush.bf16.msra.mxu0 %v3867_v50  ;;  %v2397_v15 = vpop.f32.mrf.mxu0  ;;  %v4059_v16 = vor.u32 %v4915_v31, %v4058_v52  ;;  %v4394_v41 = vld [vmem:[#allocation2 + $0x8a8] sm:$0xf]  ;;  %v4773_v48 = vld [vmem:[#allocation2 + $0x1ac] sm:$0xf]  ;;  %v4987_v30 = vld [vmem:[#allocation2 + $0x854] sm:$0xf0] }
 0x108   :  { %2664 = vmatpush.bf16.msra.mxu1 %v3995_v58  ;;  %v2398_v18 = vadd.f32 %v2397_v15, %v5739_v17  ;;  %v4426_v17 = vld [vmem:[#allocation2 + $0x8e8] sm:$0xf]  ;;  %v5007_v58 = vld [vmem:[#allocation2 + $0x8f4] sm:$0xf0] }
 0x109   :  { %2677 = vmatpush.bf16.msra.mxu2 %v4123_v4  ;;  %v4554_v4 = vld [vmem:[#allocation2 + $0x9e8] sm:$0xf] }
 0x10a   :  { %2690 = vmatpush.bf16.msra.mxu3 %v4251_v33  ;;  %v2410_v26 = vpop.f32.mrf.mxu1  ;;  %v2423_v50 = vpop.f32.mrf.mxu2  ;;  %v3404_v33 = vld [vmem:[#allocation2 + $0xf8] sm:$0xf0]  ;;  %v4555_v2 = vor.u32 %v5039_v59, %v4554_v4  ;;  %v4522_v15 = vld [vmem:[#allocation2 + $0x9a8] sm:$0xf] }
 0x10b   :  { %2652 = vmatpush.bf16.msra.mxu0 %v3851_v0  ;;  %v2411_v27 = vadd.f32 %v2410_v26, %v2398_v18  ;;  %v3407_v3 = vor.u32 %v4749_v60, %v3404_v33  ;;  %v5031_v18 = vld [vmem:[#allocation2 + $0x9b4] sm:$0xf0]  ;;  %v4378_v26 = vld [vmem:[#allocation2 + $0x888] sm:$0xf] }
 0x10c   :  { %2665 = vmatpush.bf16.msra.mxu1 %v3979_v36  ;;  %v4187_v36 = vor.u32 %v4947_v49, %v4186_v56  ;;  %v4523_v51 = vor.u32 %v5031_v18, %v4522_v15  ;;  %v4506_v31 = vld [vmem:[#allocation2 + $0x988] sm:$0xf]  ;;  %v5027_v49 = vld [vmem:[#allocation2 + $0x994] sm:$0xf0] }
 0x10d   :  { %2678 = vmatpush.bf16.msra.mxu2 %v4107_v29  ;;  %v2424_v62 = vadd.f32 %v2423_v50, %v2411_v27  ;;  %v4427_v29 = vor.u32 %v5007_v58, %v4426_v17  ;;  %v4737_v27 = vld [vmem:[#allocation2 + $0x8c] sm:$0xf]  ;;  %v3356_v50 = vld [vmem:[#allocation2 + $0x98] sm:$0xf0]  ;;  %v4362_v60 = vld [vmem:[#allocation2 + $0x868] sm:$0xf] }
 0x10e   :  { %2691 = vmatpush.bf16.msra.mxu3 %v4235_v43  ;;  %v2436_v0 = vpop.f32.mrf.mxu3  ;;  %v4769_v17 = vld [vmem:[#allocation2 + $0x18c] sm:$0xf]  ;;  %v3484_v58 = vld [vmem:[#allocation2 + $0x198] sm:$0xf0]  ;;  %v3359_v59 = vor.u32 %v4737_v27, %v3356_v50  ;;  %v4991_v33 = vld [vmem:[#allocation2 + $0x874] sm:$0xf0] }
 0x10f   :  { %2653 = vmatpush.bf16.msra.mxu0 %v3835_v32  ;;  %v5746_v61 = vadd.f32 %v2436_v0, %v2424_v62  ;;  %v2399_v43 = vpop.f32.mrf.mxu0  ;;  %v4745_v32 = vld [vmem:[#allocation2 + $0xcc] sm:$0xf]  ;;  %v4490_v62 = vld [vmem:[#allocation2 + $0x968] sm:$0xf]  ;;  %v4983_v15 = vld [vmem:[#allocation2 + $0x834] sm:$0xf0] }
 0x110   :  { %2666 = vmatpush.bf16.msra.mxu1 %v3963_v22  ;;  %v3388_v22 = vld [vmem:[#allocation2 + $0xd8] sm:$0xf0]  ;;  %v4765_v0 = vld [vmem:[#allocation2 + $0x16c] sm:$0xf]  ;;  %v3343_v43 = vor.u32 %v4733_v20, %v3340_v21  ;;  %v4346_v46 = vld [vmem:[#allocation2 + $0x848] sm:$0xf] }
 0x111   :  { %2679 = vmatpush.bf16.msra.mxu2 %v4091_v38  ;;  %v4777_v38 = vld [vmem:[#allocation2 + $0x1cc] sm:$0xf]  ;;  %v3391_v14 = vor.u32 %v4745_v32, %v3388_v22  ;;  %v3324_v22 = vld [vmem:[#allocation2 + $0x58] sm:$0xf0]  ;;  %v4442_v50 = vld [vmem:[#allocation2 + $0x908] sm:$0xf] }
 0x112   :  { %2692 = vmatpush.bf16.msra.mxu3 %v4219_v13  ;;  %v2412_v40 = vpop.f32.mrf.mxu1  ;;  %v4539_v13 = vor.u32 %v5035_v34, %v4538_v5  ;;  %v2425_v45 = vpop.f32.mrf.mxu2  ;;  %v3519_v23 = vor.u32 %v4777_v38, %v3516_v12  ;;  %v4474_v5 = vld [vmem:[#allocation2 + $0x948] sm:$0xf]  ;;  %v5019_v34 = vld [vmem:[#allocation2 + $0x954] sm:$0xf0]  ;;  %v4729_v32 = vld [vmem:[#allocation2 + $0x4c] sm:$0xf] }
 0x113   :  { %2654 = vmatpush.bf16.msra.mxu0 %v3819_v19  ;;  %v4741_v19 = vld [vmem:[#allocation2 + $0xac] sm:$0xf]  ;;  %v3452_v40 = vld [vmem:[#allocation2 + $0x158] sm:$0xf0]  ;;  %v4458_v45 = vld [vmem:[#allocation2 + $0x928] sm:$0xf] }
 0x114   :  { %2667 = vmatpush.bf16.msra.mxu1 %v3947_v24  ;;  %v3500_v24 = vld [vmem:[#allocation2 + $0x1b8] sm:$0xf0]  ;;  %v3375_v52 = vor.u32 %v4741_v19, %v3372_v47 }
 0x115   :  { %2680 = vmatpush.bf16.msra.mxu2 %v4075_v25  ;;  %v4395_v25 = vor.u32 %v4999_v44, %v4394_v41  ;;  %v3503_v56 = vor.u32 %v4773_v48, %v3500_v24  ;;  %v3327_v41 = vor.u32 %v4729_v32, %v3324_v22  ;;  %v4330_v44 = vld [vmem:[#allocation2 + $0x828] sm:$0xf]  ;;  %v5015_v48 = vld [vmem:[#allocation2 + $0x934] sm:$0xf0]  ;;  %v4725_v24 = vld [vmem:[#allocation2 + $0x2c] sm:$0xf] }
 0x116   :  { %2693 = vmatpush.bf16.msra.mxu3 %v4203_v55  ;;  %v2438_v54 = vpop.f32.mrf.mxu3  ;;  %v4995_v55 = vld [vmem:[#allocation2 + $0x894] sm:$0xf0]  ;;  %v3788_v21 = vld [vmem:[#allocation2 + $0x3f8] sm:$0xf0]  ;;  %v4809_v22 = vld [vmem:[#allocation2 + $0x2cc] sm:$0xf] }
 0x117   :  { %2655 = vmatpush.bf16.msra.mxu0 %v3803_v9  ;;  %v4379_v4 = vor.u32 %v4995_v55, %v4378_v26  ;;  %v4507_v9 = vor.u32 %v5027_v49, %v4506_v31  ;;  %v4331_v26 = vor.u32 %v4983_v15, %v4330_v44  ;;  %v4314_v55 = vld [vmem:[#allocation2 + $0x808] sm:$0xf]  ;;  %v4979_v31 = vld [vmem:[#allocation2 + $0x814] sm:$0xf0]  ;;  %v4459_v49 = vor.u32 %v5015_v48, %v4458_v45 }
 0x118   :  { %2668 = vmatpush.bf16.msra.mxu1 %v3931_v63  ;;  %v3487_v63 = vor.u32 %v4769_v17, %v3484_v58  ;;  %v5011_v17 = vld [vmem:[#allocation2 + $0x914] sm:$0xf0]  ;;  %v4721_v58 = vld [vmem:[#allocation2 + $0xc] sm:$0xf]  ;;  %v4315_v20 = vor.u32 %v4979_v31, %v4314_v55 }
 0x119   :  { %2681 = vmatpush.bf16.msra.mxu2 %v4059_v16  ;;  %v5023_v16 = vld [vmem:[#allocation2 + $0x974] sm:$0xf0] }
 0x11a   :  { %2694 = vmatpush.bf16.msra.mxu3 %v4187_v36  ;;  %2656 = vmatmul.bf16.vlgmr.msra.gmra.mxu0 %v5677_v53  ;;  %v3468_v36 = vld [vmem:[#allocation2 + $0x178] sm:$0xf0] }
 0x11b   :  { %2700 = vmatpush.bf16.msrb.mxu0 %v4427_v29  ;;  %2669 = vmatmul.bf16.vlgmr.msra.gmra.mxu1 %v5691_v39  ;;  %v658_v29 = vperm.slane %v5736_v7, 1  ;;  %v4347_v7 = vor.u32 %v4987_v30, %v4346_v46 }
 0x11c   :  { %2713 = vmatpush.bf16.msrb.mxu1 %v4555_v2  ;;  %2682 = vmatmul.bf16.vlgmr.msra.gmra.mxu2 %v5673_v42  ;;  %v4363_v2 = vor.u32 %v4991_v33, %v4362_v60 }
 0x11d   :  { %2726 = vmatpush.bf16.msrb.mxu2 %v3407_v3  ;;  %2695 = vmatmul.bf16.vlgmr.msra.gmra.mxu3 %v5680_v57  ;;  %v4491_v3 = vor.u32 %v5023_v16, %v4490_v62  ;;  %v4813_v62 = vld [vmem:[#allocation2 + $0x2ec] sm:$0xf] }
 0x11e   :  { %2739 = vmatpush.bf16.msrb.mxu3 %v3535_v6  ;;  %v3471_v6 = vor.u32 %v4765_v0, %v3468_v36  ;;  %v4845_v16 = vld [vmem:[#allocation2 + $0x3ec] sm:$0xf]  ;;  %v3916_v36 = vld [vmem:[#allocation2 + $0x4f8] sm:$0xf0] }
 0x11f   :  { %2701 = vmatpush.bf16.msrb.mxu0 %v4411_v35  ;;  %v2475_v38 = vpop.f32.mrf.mxu2  ;;  %v4761_v35 = vld [vmem:[#allocation2 + $0x14c] sm:$0xf] }
 0x120   :  { %2714 = vmatpush.bf16.msrb.mxu1 %v4539_v13  ;;  %v2488_v12 = vpop.f32.mrf.mxu3  ;;  %v2476_v13 = vadd.f32 %v2475_v38, %v658_v29  ;;  %v3455_v47 = vor.u32 %v4761_v35, %v3452_v40  ;;  %v4877_v0 = vld [vmem:[#allocation2 + $0x4ec] sm:$0xf]  ;;  %v4443_v29 = vor.u32 %v5011_v17, %v4442_v50  ;;  %v3644_v38 = vld [vmem:[#allocation2 + $0x2d8] sm:$0xf0] }
 0x121   :  { %2727 = vmatpush.bf16.msrb.mxu2 %v3391_v14  ;;  %v4475_v14 = vor.u32 %v5019_v34, %v4474_v5  ;;  %v2449_v18 = vpop.f32.mrf.mxu0  ;;  %v3791_v34 = vor.u32 %v4845_v16, %v3788_v21  ;;  %v3919_v32 = vor.u32 %v4877_v0, %v3916_v36  ;;  %v3772_v40 = vld [vmem:[#allocation2 + $0x3d8] sm:$0xf0]  ;;  %v3647_v44 = vor.u32 %v4809_v22, %v3644_v38  ;;  %v4833_v50 = vld [vmem:[#allocation2 + $0x38c] sm:$0xf] }
 0x122   :  { %2740 = vmatpush.bf16.msrb.mxu3 %v3519_v23  ;;  %v5753_v23 = vadd.f32 %v2488_v12, %v2476_v13  ;;  %v2462_v19 = vpop.f32.mrf.mxu1  ;;  %v2450_v54 = vadd.f32 %v2449_v18, %v5746_v61  ;;  %v3420_v61 = vld [vmem:[#allocation2 + $0x118] sm:$0xf0]  ;;  %v4841_v12 = vld [vmem:[#allocation2 + $0x3cc] sm:$0xf] }
 0x123   :  { %2702 = vmatpush.bf16.msrb.mxu0 %v4395_v25  ;;  %v3308_v25 = vld [vmem:[#allocation2 + $0x38] sm:$0xf0]  ;;  %v4873_v13 = vld [vmem:[#allocation2 + $0x4cc] sm:$0xf]  ;;  %v3775_v15 = vor.u32 %v4841_v12, %v3772_v40 }
 0x124   :  { %2715 = vmatpush.bf16.msrb.mxu1 %v4523_v51  ;;  %v4757_v51 = vld [vmem:[#allocation2 + $0x12c] sm:$0xf]  ;;  %v3311_v27 = vor.u32 %v4725_v24, %v3308_v25  ;;  %v3756_v24 = vld [vmem:[#allocation2 + $0x3b8] sm:$0xf0] }
 0x125   :  { %2728 = vmatpush.bf16.msrb.mxu2 %v3375_v52  ;;  %v3436_v52 = vld [vmem:[#allocation2 + $0x138] sm:$0xf0]  ;;  %v4805_v18 = vld [vmem:[#allocation2 + $0x2ac] sm:$0xf] }
 0x126   :  { %2741 = vmatpush.bf16.msrb.mxu3 %v3503_v56  ;;  %v5756_v56 = vadd.f32 %v2462_v19, %v2450_v54  ;;  %v3628_v19 = vld [vmem:[#allocation2 + $0x2b8] sm:$0xf0]  ;;  %v4869_v25 = vld [vmem:[#allocation2 + $0x4ac] sm:$0xf] }
 0x127   :  { %2703 = vmatpush.bf16.msrb.mxu0 %v4379_v4  ;;  %v3439_v4 = vor.u32 %v4757_v51, %v3436_v52  ;;  %v2477_v60 = vpop.f32.mrf.mxu2  ;;  %v3884_v54 = vld [vmem:[#allocation2 + $0x4b8] sm:$0xf0]  ;;  %v4901_v51 = vld [vmem:[#allocation2 + $0x5ac] sm:$0xf] }
 0x128   :  { %2716 = vmatpush.bf16.msrb.mxu1 %v4507_v9  ;;  %v3292_v9 = vld [vmem:[#allocation2 + $0x18] sm:$0xf0]  ;;  %v2490_v33 = vpop.f32.mrf.mxu3  ;;  %v3887_v31 = vor.u32 %v4869_v25, %v3884_v54  ;;  %v4861_v0 = vld [vmem:[#allocation2 + $0x46c] sm:$0xf] }
 0x129   :  { %2729 = vmatpush.bf16.msrb.mxu2 %v3359_v59  ;;  %v4753_v59 = vld [vmem:[#allocation2 + $0x10c] sm:$0xf]  ;;  %v2451_v5 = vpop.f32.mrf.mxu0  ;;  %v4012_v52 = vld [vmem:[#allocation2 + $0x5b8] sm:$0xf0] }
 0x12a   :  { %2742 = vmatpush.bf16.msrb.mxu3 %v3487_v63  ;;  %v3660_v63 = vld [vmem:[#allocation2 + $0x2f8] sm:$0xf0]  ;;  %v3423_v46 = vor.u32 %v4753_v59, %v3420_v61  ;;  %v4015_v17 = vor.u32 %v4901_v51, %v4012_v52  ;;  %v4897_v59 = vld [vmem:[#allocation2 + $0x58c] sm:$0xf] }
 0x12b   :  { %2704 = vmatpush.bf16.msrb.mxu0 %v4363_v2  ;;  %v3295_v2 = vor.u32 %v4721_v58, %v3292_v9  ;;  %v3663_v30 = vor.u32 %v4813_v62, %v3660_v63  ;;  %v3740_v58 = vld [vmem:[#allocation2 + $0x398] sm:$0xf0]  ;;  %v4797_v33 = vld [vmem:[#allocation2 + $0x26c] sm:$0xf] }
 0x12c   :  { %2717 = vmatpush.bf16.msrb.mxu1 %v4491_v3  ;;  %v4909_v3 = vld [vmem:[#allocation2 + $0x5ec] sm:$0xf]  ;;  %v3868_v9 = vld [vmem:[#allocation2 + $0x498] sm:$0xf0]  ;;  %v3743_v60 = vor.u32 %v4833_v50, %v3740_v58 }
 0x12d   :  { %2730 = vmatpush.bf16.msrb.mxu2 %v3343_v43  ;;  %v4044_v43 = vld [vmem:[#allocation2 + $0x5f8] sm:$0xf0]  ;;  %v4829_v63 = vld [vmem:[#allocation2 + $0x36c] sm:$0xf] }
 0x12e   :  { %2743 = vmatpush.bf16.msrb.mxu3 %v3471_v6  ;;  %v2464_v6 = vpop.f32.mrf.mxu1  ;;  %v4047_v35 = vor.u32 %v4909_v3, %v4044_v43  ;;  %v3996_v61 = vld [vmem:[#allocation2 + $0x598] sm:$0xf0]  ;;  %v4793_v5 = vld [vmem:[#allocation2 + $0x24c] sm:$0xf] }
 0x12f   :  { %2705 = vmatpush.bf16.msrb.mxu0 %v4347_v7  ;;  %v3900_v7 = vld [vmem:[#allocation2 + $0x4d8] sm:$0xf0]  ;;  %v4857_v38 = vld [vmem:[#allocation2 + $0x44c] sm:$0xf] }
 0x130   :  { %2718 = vmatpush.bf16.msrb.mxu1 %v4475_v14  ;;  %v4905_v14 = vld [vmem:[#allocation2 + $0x5cc] sm:$0xf]  ;;  %v3903_v45 = vor.u32 %v4873_v13, %v3900_v7  ;;  %v3596_v62 = vld [vmem:[#allocation2 + $0x278] sm:$0xf0] }
 0x131   :  { %2731 = vmatpush.bf16.msrb.mxu2 %v3327_v41  ;;  %v4028_v41 = vld [vmem:[#allocation2 + $0x5d8] sm:$0xf0]  ;;  %v3599_v3 = vor.u32 %v4797_v33, %v3596_v62  ;;  %v4889_v40 = vld [vmem:[#allocation2 + $0x54c] sm:$0xf] }
 0x132   :  { %2744 = vmatpush.bf16.msrb.mxu3 %v3455_v47  ;;  %v4837_v47 = vld [vmem:[#allocation2 + $0x3ac] sm:$0xf]  ;;  %v4031_v48 = vor.u32 %v4905_v14, %v4028_v41  ;;  %v3724_v21 = vld [vmem:[#allocation2 + $0x378] sm:$0xf0] }
 0x133   :  { %2706 = vmatpush.bf16.msrb.mxu0 %v4331_v26  ;;  %v3631_v26 = vor.u32 %v4805_v18, %v3628_v19  ;;  %v3759_v55 = vor.u32 %v4837_v47, %v3756_v24  ;;  %v3852_v36 = vld [vmem:[#allocation2 + $0x478] sm:$0xf0]  ;;  %v4821_v18 = vld [vmem:[#allocation2 + $0x32c] sm:$0xf] }
 0x134   :  { %2719 = vmatpush.bf16.msrb.mxu1 %v4459_v49  ;;  %v4801_v49 = vld [vmem:[#allocation2 + $0x28c] sm:$0xf]  ;;  %v3580_v6 = vld [vmem:[#allocation2 + $0x258] sm:$0xf0] }
 0x135   :  { %2732 = vmatpush.bf16.msrb.mxu2 %v3311_v27  ;;  %v3612_v27 = vld [vmem:[#allocation2 + $0x298] sm:$0xf0]  ;;  %v3583_v14 = vor.u32 %v4793_v5, %v3580_v6  ;;  %v4853_v24 = vld [vmem:[#allocation2 + $0x42c] sm:$0xf] }
 0x136   :  { %2745 = vmatpush.bf16.msrb.mxu3 %v3439_v4  ;;  %v4865_v4 = vld [vmem:[#allocation2 + $0x48c] sm:$0xf]  ;;  %v3708_v22 = vld [vmem:[#allocation2 + $0x358] sm:$0xf0] }
 0x137   :  { %2707 = vmatpush.bf16.msrb.mxu0 %v4315_v20  ;;  %v5762_v16 = vpop.f32.mrf.mxu0  ;;  %v3999_v20 = vor.u32 %v4897_v59, %v3996_v61  ;;  %v3836_v12 = vld [vmem:[#allocation2 + $0x458] sm:$0xf0]  ;;  %v4885_v54 = vld [vmem:[#allocation2 + $0x52c] sm:$0xf] }
 0x138   :  { %2720 = vmatpush.bf16.msrb.mxu1 %v4443_v29  ;;  %v4893_v29 = vld [vmem:[#allocation2 + $0x56c] sm:$0xf]  ;;  %v5764_v43 = vpop.f32.mrf.mxu1  ;;  %v3964_v13 = vld [vmem:[#allocation2 + $0x558] sm:$0xf0] }
 0x139   :  { %2733 = vmatpush.bf16.msrb.mxu2 %v3295_v2  ;;  %v3980_v2 = vld [vmem:[#allocation2 + $0x578] sm:$0xf0]  ;;  %v3967_v47 = vor.u32 %v4889_v40, %v3964_v13  ;;  %v4817_v50 = vld [vmem:[#allocation2 + $0x30c] sm:$0xf] }
 0x13a   :  { %2746 = vmatpush.bf16.msrb.mxu3 %v3423_v46  ;;  %2708 = vmatmul.bf16.vlgmr.msrb.gmra.mxu0 %v5722_v8  ;;  %v3727_v46 = vor.u32 %v4829_v63, %v3724_v21  ;;  %v3820_v25 = vld [vmem:[#allocation2 + $0x438] sm:$0xf0]  ;;  %v4849_v58 = vld [vmem:[#allocation2 + $0x40c] sm:$0xf] }
 0x13b   :  { %2752 = vmatpush.bf16.msra.mxu0 %v3663_v30  ;;  %2721 = vmatmul.bf16.vlgmr.msrb.gmra.mxu1 %v5724_v11  ;;  %v3855_v30 = vor.u32 %v4861_v0, %v3852_v36  ;;  %v3948_v51 = vld [vmem:[#allocation2 + $0x538] sm:$0xf0]  ;;  %v4881_v59 = vld [vmem:[#allocation2 + $0x50c] sm:$0xf] }
 0x13c   :  { %2765 = vmatpush.bf16.msra.mxu1 %v3791_v34  ;;  %2734 = vmatmul.bf16.vlgmr.msrb.gmra.mxu2 %v5585_v10  ;;  %v3615_v10 = vor.u32 %v4801_v49, %v3612_v27  ;;  %v4825_v34 = vld [vmem:[#allocation2 + $0x34c] sm:$0xf]  ;;  %v3823_v27 = vor.u32 %v4853_v24, %v3820_v25  ;;  %v3932_v61 = vld [vmem:[#allocation2 + $0x518] sm:$0xf0] }
 0x13d   :  { %2778 = vmatpush.bf16.msra.mxu2 %v3919_v32  ;;  %2747 = vmatmul.bf16.vlgmr.msrb.gmra.mxu3 %v5662_v28  ;;  %v3871_v28 = vor.u32 %v4865_v4, %v3868_v9  ;;  %v3983_v32 = vor.u32 %v4893_v29, %v3980_v2  ;;  %v3711_v41 = vor.u32 %v4825_v34, %v3708_v22  ;;  %v3804_v9 = vld [vmem:[#allocation2 + $0x418] sm:$0xf0]  ;;  %v4973_v33 = vld [vmem:[#allocation2 + $0x7ec] sm:$0xf] }
 0x13e   :  { %2791 = vmatpush.bf16.msra.mxu3 %v4047_v35  ;;  %v3951_v4 = vor.u32 %v4885_v54, %v3948_v51  ;;  %v5005_v21 = vld [vmem:[#allocation2 + $0x8ec] sm:$0xf]  ;;  %v4428_v0 = vld [vmem:[#allocation2 + $0x8f8] sm:$0xf0]  ;;  %v3807_v29 = vor.u32 %v4849_v58, %v3804_v9 }
 0x13f   :  { %2753 = vmatpush.bf16.msra.mxu0 %v3647_v44  ;;  %v5766_v35 = vpop.f32.mrf.mxu2  ;;  %v3839_v44 = vor.u32 %v4857_v38, %v3836_v12  ;;  %v2503_v19 = vpop.f32.mrf.mxu0  ;;  %v5037_v2 = vld [vmem:[#allocation2 + $0x9ec] sm:$0xf]  ;;  %v4431_v6 = vor.u32 %v5005_v21, %v4428_v0  ;;  %v4284_v12 = vld [vmem:[#allocation2 + $0x7d8] sm:$0xf0] }
 0x140   :  { %2766 = vmatpush.bf16.msra.mxu1 %v3775_v15  ;;  %v5768_v7 = vpop.f32.mrf.mxu3  ;;  %v4789_v15 = vld [vmem:[#allocation2 + $0x22c] sm:$0xf]  ;;  %v4412_v13 = vld [vmem:[#allocation2 + $0x8d8] sm:$0xf0] }
 0x141   :  { %2779 = vmatpush.bf16.msra.mxu2 %v3903_v45  ;;  %v3564_v45 = vld [vmem:[#allocation2 + $0x238] sm:$0xf0]  ;;  %v4937_v34 = vld [vmem:[#allocation2 + $0x6cc] sm:$0xf] }
 0x142   :  { %2792 = vmatpush.bf16.msra.mxu3 %v4031_v48  ;;  %v3692_v48 = vld [vmem:[#allocation2 + $0x338] sm:$0xf0]  ;;  %v3567_v52 = vor.u32 %v4789_v15, %v3564_v45  ;;  %v4969_v22 = vld [vmem:[#allocation2 + $0x7cc] sm:$0xf] }
 0x143   :  { %2754 = vmatpush.bf16.msra.mxu0 %v3631_v26  ;;  %v4785_v26 = vld [vmem:[#allocation2 + $0x20c] sm:$0xf]  ;;  %v3695_v49 = vor.u32 %v4821_v18, %v3692_v48  ;;  %v4287_v15 = vor.u32 %v4969_v22, %v4284_v12  ;;  %v4140_v19 = vld [vmem:[#allocation2 + $0x6b8] sm:$0xf0] }
 0x144   :  { %2767 = vmatpush.bf16.msra.mxu1 %v3759_v55  ;;  %v3548_v55 = vld [vmem:[#allocation2 + $0x218] sm:$0xf0]  ;;  %v5001_v40 = vld [vmem:[#allocation2 + $0x8cc] sm:$0xf] }
 0x145   :  { %2780 = vmatpush.bf16.msra.mxu2 %v3887_v31  ;;  %v2516_v31 = vpop.f32.mrf.mxu1  ;;  %v3551_v63 = vor.u32 %v4785_v26, %v3548_v55  ;;  %v4415_v45 = vor.u32 %v5001_v40, %v4412_v13  ;;  %v4933_v18 = vld [vmem:[#allocation2 + $0x6ac] sm:$0xf]  ;;  %v4268_v24 = vld [vmem:[#allocation2 + $0x7b8] sm:$0xf0] }
 0x146   :  { %2793 = vmatpush.bf16.msra.mxu3 %v4015_v17  ;;  %v3676_v17 = vld [vmem:[#allocation2 + $0x318] sm:$0xf0]  ;;  %v4997_v25 = vld [vmem:[#allocation2 + $0x8ac] sm:$0xf]  ;;  %v4143_v26 = vor.u32 %v4933_v18, %v4140_v19 }
 0x147   :  { %2755 = vmatpush.bf16.msra.mxu0 %v3615_v10  ;;  %v2529_v10 = vpop.f32.mrf.mxu2  ;;  %v3679_v36 = vor.u32 %v4817_v50, %v3676_v17  ;;  %v4396_v54 = vld [vmem:[#allocation2 + $0x8b8] sm:$0xf0]  ;;  %v5029_v51 = vld [vmem:[#allocation2 + $0x9ac] sm:$0xf] }
 0x148   :  { %2768 = vmatpush.bf16.msra.mxu1 %v3743_v60  ;;  %v4941_v60 = vld [vmem:[#allocation2 + $0x6ec] sm:$0xf]  ;;  %v2542_v62 = vpop.f32.mrf.mxu3  ;;  %v4399_v31 = vor.u32 %v4997_v25, %v4396_v54  ;;  %v4252_v17 = vld [vmem:[#allocation2 + $0x798] sm:$0xf0] }
 0x149   :  { %2781 = vmatpush.bf16.msra.mxu2 %v3871_v28  ;;  %v4172_v28 = vld [vmem:[#allocation2 + $0x6f8] sm:$0xf0]  ;;  %v4993_v58 = vld [vmem:[#allocation2 + $0x88c] sm:$0xf] }
 0x14a   :  { %2794 = vmatpush.bf16.msra.mxu3 %v3999_v20  ;;  %v4300_v20 = vld [vmem:[#allocation2 + $0x7f8] sm:$0xf0]  ;;  %v5021_v0 = vld [vmem:[#allocation2 + $0x96c] sm:$0xf] }
 0x14b   :  { %2756 = vmatpush.bf16.msra.mxu0 %v3599_v3  ;;  %v4556_v3 = vld [vmem:[#allocation2 + $0x9f8] sm:$0xf0]  ;;  %v4303_v5 = vor.u32 %v4973_v33, %v4300_v20  ;;  %v4957_v33 = vld [vmem:[#allocation2 + $0x76c] sm:$0xf] }
 0x14c   :  { %2769 = vmatpush.bf16.msra.mxu1 %v3727_v46  ;;  %v3935_v46 = vor.u32 %v4881_v59, %v3932_v61  ;;  %v4559_v38 = vor.u32 %v5037_v2, %v4556_v3  ;;  %v4989_v20 = vld [vmem:[#allocation2 + $0x86c] sm:$0xf]  ;;  %v4364_v21 = vld [vmem:[#allocation2 + $0x878] sm:$0xf0] }
 0x14d   :  { %2782 = vmatpush.bf16.msra.mxu2 %v3855_v30  ;;  %v4175_v30 = vor.u32 %v4941_v60, %v4172_v28  ;;  %v4925_v60 = vld [vmem:[#allocation2 + $0x66c] sm:$0xf]  ;;  %v4108_v28 = vld [vmem:[#allocation2 + $0x678] sm:$0xf0]  ;;  %v4367_v3 = vor.u32 %v4989_v20, %v4364_v21  ;;  %v2502_v20 = vadd.f32 %v5762_v16, %v5753_v23  ;;  %v5046_v21 = vld [vmem:[#allocation7 + $0x30] sm:$0xff] }
 0x14e   :  { %2795 = vmatpush.bf16.msra.mxu3 %v3983_v32  ;;  %v4156_v32 = vld [vmem:[#allocation2 + $0x6d8] sm:$0xf0]  ;;  %v4985_v22 = vld [vmem:[#allocation2 + $0x84c] sm:$0xf] }
 0x14f   :  { %2757 = vmatpush.bf16.msra.mxu0 %v3583_v14  ;;  %v5033_v14 = vld [vmem:[#allocation2 + $0x9cc] sm:$0xf]  ;;  %v4476_v13 = vld [vmem:[#allocation2 + $0x958] sm:$0xf0] }
 0x150   :  { %2770 = vmatpush.bf16.msra.mxu1 %v3711_v41  ;;  %v4540_v41 = vld [vmem:[#allocation2 + $0x9d8] sm:$0xf0]  ;;  %v5017_v40 = vld [vmem:[#allocation2 + $0x94c] sm:$0xf] }
 0x151   :  { %2783 = vmatpush.bf16.msra.mxu2 %v3839_v44  ;;  %v4159_v44 = vor.u32 %v4937_v34, %v4156_v32  ;;  %v4543_v48 = vor.u32 %v5033_v14, %v4540_v41  ;;  %v4220_v32 = vld [vmem:[#allocation2 + $0x758] sm:$0xf0]  ;;  %v4917_v18 = vld [vmem:[#allocation2 + $0x62c] sm:$0xf] }
 0x152   :  { %2796 = vmatpush.bf16.msra.mxu3 %v3967_v47  ;;  %v4965_v47 = vld [vmem:[#allocation2 + $0x7ac] sm:$0xf]  ;;  %v4076_v19 = vld [vmem:[#allocation2 + $0x638] sm:$0xf0] }
 0x153   :  { %2758 = vmatpush.bf16.msra.mxu0 %v3567_v52  ;;  %v4524_v52 = vld [vmem:[#allocation2 + $0x9b8] sm:$0xf0]  ;;  %v4271_v55 = vor.u32 %v4965_v47, %v4268_v24  ;;  %v4949_v47 = vld [vmem:[#allocation2 + $0x72c] sm:$0xf] }
 0x154   :  { %2771 = vmatpush.bf16.msra.mxu1 %v3695_v49  ;;  %v4929_v49 = vld [vmem:[#allocation2 + $0x68c] sm:$0xf]  ;;  %v4527_v50 = vor.u32 %v5029_v51, %v4524_v52  ;;  %v4204_v24 = vld [vmem:[#allocation2 + $0x738] sm:$0xf0] }
 0x155   :  { %2784 = vmatpush.bf16.msra.mxu2 %v3823_v27  ;;  %v4124_v27 = vld [vmem:[#allocation2 + $0x698] sm:$0xf0]  ;;  %v4981_v25 = vld [vmem:[#allocation2 + $0x82c] sm:$0xf] }
 0x156   :  { %2797 = vmatpush.bf16.msra.mxu3 %v3951_v4  ;;  %v4380_v4 = vld [vmem:[#allocation2 + $0x898] sm:$0xf0]  ;;  %v4127_v59 = vor.u32 %v4929_v49, %v4124_v27  ;;  %v5013_v51 = vld [vmem:[#allocation2 + $0x92c] sm:$0xf] }
 0x157   :  { %2759 = vmatpush.bf16.msra.mxu0 %v3551_v63  ;;  %v5774_v9 = vpop.f32.mrf.mxu0  ;;  %v4383_v10 = vor.u32 %v4993_v58, %v4380_v4  ;;  %v4236_v63 = vld [vmem:[#allocation2 + $0x778] sm:$0xf0]  ;;  %v4913_v49 = vld [vmem:[#allocation2 + $0x60c] sm:$0xf] }
 0x158   :  { %2772 = vmatpush.bf16.msra.mxu1 %v3679_v36  ;;  %v5776_v61 = vpop.f32.mrf.mxu1  ;;  %v4492_v36 = vld [vmem:[#allocation2 + $0x978] sm:$0xf0]  ;;  %v4239_v2 = vor.u32 %v4957_v33, %v4236_v63  ;;  %v4977_v58 = vld [vmem:[#allocation2 + $0x80c] sm:$0xf] }
 0x159   :  { %2785 = vmatpush.bf16.msra.mxu2 %v3807_v29  ;;  %v4111_v29 = vor.u32 %v4925_v60, %v4108_v28  ;;  %v4332_v54 = vld [vmem:[#allocation2 + $0x838] sm:$0xf0]  ;;  %v5045_v23 = vld [vmem:[#allocation7 + $0x28] sm:$0xff] }
 0x15a   :  { %2798 = vmatpush.bf16.msra.mxu3 %v3935_v46  ;;  %2760 = vmatmul.bf16.vlgmr.msra.gmra.mxu0 %v5574_v1  ;;  %v5025_v1 = vld [vmem:[#allocation2 + $0x98c] sm:$0xf]  ;;  %v4460_v52 = vld [vmem:[#allocation2 + $0x938] sm:$0xf0] }
 0x15b   :  { %2804 = vmatpush.bf16.msrb.mxu0 %v4175_v30  ;;  %2773 = vmatmul.bf16.vlgmr.msra.gmra.mxu1 %v5610_v37  ;;  %v4921_v46 = vld [vmem:[#allocation2 + $0x64c] sm:$0xf]  ;;  %v4092_v30 = vld [vmem:[#allocation2 + $0x658] sm:$0xf0] }
 0x15c   :  { %2817 = vmatpush.bf16.msrb.mxu1 %v4303_v5  ;;  %2786 = vmatmul.bf16.vlgmr.msra.gmra.mxu2 %v5677_v53  ;;  %v4961_v53 = vld [vmem:[#allocation2 + $0x78c] sm:$0xf]  ;;  %v4095_v41 = vor.u32 %v4921_v46, %v4092_v30  ;;  %v4060_v27 = vld [vmem:[#allocation2 + $0x618] sm:$0xf0] }
 0x15d   :  { %2830 = vmatpush.bf16.msrb.mxu2 %v4431_v6  ;;  %2799 = vmatmul.bf16.vlgmr.msra.gmra.mxu3 %v5691_v39  ;;  %v4508_v39 = vld [vmem:[#allocation2 + $0x998] sm:$0xf0]  ;;  %v4255_v37 = vor.u32 %v4961_v53, %v4252_v17  ;;  %v4953_v5 = vld [vmem:[#allocation2 + $0x74c] sm:$0xf]  ;;  %v4495_v6 = vor.u32 %v5021_v0, %v4492_v36  ;;  %v5054_v36 = vld [vmem:[#allocation7 + $0x70] sm:$0xff] }
 0x15e   :  { %2843 = vmatpush.bf16.msrb.mxu3 %v4559_v38  ;;  %v4511_v62 = vor.u32 %v5025_v1, %v4508_v39  ;;  %v4348_v38 = vld [vmem:[#allocation2 + $0x858] sm:$0xf0]  ;;  %v4945_v53 = vld [vmem:[#allocation2 + $0x70c] sm:$0xf] }
 0x15f   :  { %2805 = vmatpush.bf16.msrb.mxu0 %v4159_v44  ;;  %v5778_v34 = vpop.f32.mrf.mxu2  ;;  %v2555_v14 = vpop.f32.mrf.mxu0  ;;  %v4188_v17 = vld [vmem:[#allocation2 + $0x718] sm:$0xf0]  ;;  %v5009_v39 = vld [vmem:[#allocation2 + $0x90c] sm:$0xf] }
 0x160   :  { %2818 = vmatpush.bf16.msrb.mxu1 %v4287_v15  ;;  %v5780_v12 = vpop.f32.mrf.mxu3  ;;  %v2568_v44 = vpop.f32.mrf.mxu1  ;;  %v4223_v15 = vor.u32 %v4953_v5, %v4220_v32  ;;  %v4316_v4 = vld [vmem:[#allocation2 + $0x818] sm:$0xf0]  ;;  %v4191_v60 = vor.u32 %v4945_v53, %v4188_v17  ;;  %v5053_v16 = vld [vmem:[#allocation7 + $0x68] sm:$0xff]  ;;  %v5050_v14 = vld [vmem:[#allocation7 + $0x50] sm:$0xff] }
 0x161   :  { %2831 = vmatpush.bf16.msrb.mxu2 %v4415_v45  ;;  %v4351_v45 = vor.u32 %v4985_v22, %v4348_v38  ;;  %v4319_v28 = vor.u32 %v4977_v58, %v4316_v4  ;;  %v5055_v63 = vld [vmem:[#allocation7 + $0x78] sm:$0xff]  ;;  %v5061_v22 = vld [vmem:[#allocation7 + $0xa8] sm:$0xff]  ;;  %v5042_v38 = vld [vmem:[#allocation7 + $0x10] sm:$0xff] }
 0x162   :  { %2844 = vmatpush.bf16.msrb.mxu3 %v4543_v48  ;;  %v4479_v48 = vor.u32 %v5017_v40, %v4476_v13  ;;  %v5063_v0 = vld [vmem:[#allocation7 + $0xb8] sm:$0xff]  ;;  %v5060_v13 = vld [vmem:[#allocation7 + $0xa0] sm:$0xff] }
 0x163   :  { %2806 = vmatpush.bf16.msrb.mxu0 %v4143_v26  ;;  %v4079_v26 = vor.u32 %v4917_v18, %v4076_v19  ;;  %v5051_v5 = vld [vmem:[#allocation7 + $0x58] sm:$0xff]  ;;  %v5040_v19 = vld [vmem:[#allocation7] sm:$0xff] }
 0x164   :  { %2819 = vmatpush.bf16.msrb.mxu1 %v4271_v55  ;;  %v4207_v55 = vor.u32 %v4949_v47, %v4204_v24  ;;  %v5059_v44 = vld [vmem:[#allocation7 + $0x98] sm:$0xff]  ;;  %v5058_v47 = vld [vmem:[#allocation7 + $0x90] sm:$0xff]  ;;  %v5048_v24 = vld [vmem:[#allocation7 + $0x40] sm:$0xff] }
 0x165   :  { %2832 = vmatpush.bf16.msrb.mxu2 %v4399_v31  ;;  %v4335_v31 = vor.u32 %v4981_v25, %v4332_v54 }
 0x166   :  { %2845 = vmatpush.bf16.msrb.mxu3 %v4527_v50  ;;  %v4463_v50 = vor.u32 %v5013_v51, %v4460_v52  ;;  %v5093_v51 = vld [vmem:[#allocation5] sm:$0xf] }
 0x167   :  { %2807 = vmatpush.bf16.msrb.mxu0 %v4127_v59  ;;  %v2581_v1 = vpop.f32.mrf.mxu2  ;;  %v4444_v59 = vld [vmem:[#allocation2 + $0x918] sm:$0xf0]  ;;  %v659_v52 = vperm.slane %v5093_v51, 2 }
 0x168   :  { %2820 = vmatpush.bf16.msrb.mxu1 %v4255_v37  ;;  %v2594_v37 = vpop.f32.mrf.mxu3  ;;  %v4447_v33 = vor.u32 %v5009_v39, %v4444_v59 }
 0x169   :  { %2833 = vmatpush.bf16.msrb.mxu2 %v4383_v10  ;;  %v4063_v10 = vor.u32 %v4913_v49, %v4060_v27 }
 0x16a   :  { %2846 = vmatpush.bf16.msrb.mxu3 %v4511_v62  ;;  %v5047_v62 = vld [vmem:[#allocation7 + $0x38] sm:$0xff] }
 0x16b   :  { %2808 = vmatpush.bf16.msrb.mxu0 %v4111_v29  ;;  %v2515_v29 = vadd.f32 %v5764_v43, %v2502_v20  ;;  %v5062_v43 = vld [vmem:[#allocation7 + $0xb0] sm:$0xff] }
 0x16c   :  { %2821 = vmatpush.bf16.msrb.mxu1 %v4239_v2 }
 0x16d   :  { %2834 = vmatpush.bf16.msrb.mxu2 %v4367_v3  ;;  %v2528_v2 = vadd.f32 %v5766_v35, %v2515_v29  ;;  %v5044_v3 = vld [vmem:[#allocation7 + $0x20] sm:$0xff] }
 0x16e   :  { %2847 = vmatpush.bf16.msrb.mxu3 %v4495_v6 }
 0x16f   :  { %2809 = vmatpush.bf16.msrb.mxu0 %v4095_v41 }
 0x170   :  { %2822 = vmatpush.bf16.msrb.mxu1 %v4223_v15  ;;  %v5049_v15 = vld [vmem:[#allocation7 + $0x48] sm:$0xff] }
 0x171   :  { %2835 = vmatpush.bf16.msrb.mxu2 %v4351_v45 }
 0x172   :  { %2848 = vmatpush.bf16.msrb.mxu3 %v4479_v48  ;;  %v2856_v48 = vmax.f32 %v5756_v56, 0.0  ;;  %v5056_v56 = vld [vmem:[#allocation7 + $0x80] sm:$0xff] }
 0x173   :  { %2810 = vmatpush.bf16.msrb.mxu0 %v4079_v26 }
 0x174   :  { %2823 = vmatpush.bf16.msrb.mxu1 %v4207_v55 }
 0x175   :  { %2836 = vmatpush.bf16.msrb.mxu2 %v4335_v31  ;;  %v5057_v31 = vld [vmem:[#allocation7 + $0x88] sm:$0xff] }
 0x176   :  { %2849 = vmatpush.bf16.msrb.mxu3 %v4463_v50 }
 0x177   :  { %2811 = vmatpush.bf16.msrb.mxu0 %v4063_v10  ;;  %v2605_v46 = vpop.f32.mrf.mxu0 }
 0x178   :  { %2824 = vmatpush.bf16.msrb.mxu1 %v4191_v60  ;;  %v2618_v30 = vpop.f32.mrf.mxu1 }
 0x179   :  { %2837 = vmatpush.bf16.msrb.mxu2 %v4319_v28 }
 0x17a   :  { %2850 = vmatpush.bf16.msrb.mxu3 %v4447_v33  ;;  %2812 = vmatmul.bf16.vlgmr.msrb.gmra.mxu0 %v5673_v42  ;;  %v5052_v42 = vld [vmem:[#allocation7 + $0x60] sm:$0xff] }
 0x17b   :  { %3124 = vmatpush.bf16.msra.mxu0 %v5047_v62  ;;  %2825 = vmatmul.bf16.vlgmr.msrb.gmra.mxu1 %v5680_v57  ;;  %v2541_v57 = vadd.f32 %v5768_v7, %v2528_v2  ;;  %v5070_v2 = vld [vmem:[#allocation7 + $0xf0] sm:$0xff] }
 0x17c   :  { %3137 = vmatpush.bf16.msra.mxu1 %v5055_v63  ;;  %2838 = vmatmul.bf16.vlgmr.msrb.gmra.mxu2 %v5722_v8 }
 0x17d   :  { %2851 = vmatmul.bf16.vlgmr.msrb.gmra.mxu3 %v5724_v11  ;;  %3150 = vmatpush.bf16.msra.mxu2 %v5063_v0  ;;  %v2554_v8 = vadd.f32 %v5774_v9, %v2541_v57  ;;  %v5043_v11 = vld [vmem:[#allocation7 + $0x18] sm:$0xff]  ;;  %v5041_v9 = vld [vmem:[#allocation7 + $0x8] sm:$0xff] }
 0x17f   :  { %3125 = vmatpush.bf16.msra.mxu0 %v5046_v21  ;;  %v2631_v6 = vpop.f32.mrf.mxu2  ;;  %v2567_v35 = vadd.f32 %v5776_v61, %v2554_v8  ;;  %v2607_v40 = vpop.f32.mrf.mxu0 }
 0x180   :  { %3138 = vmatpush.bf16.msra.mxu1 %v5054_v36  ;;  %v2644_v32 = vpop.f32.mrf.mxu3  ;;  %v2620_v7 = vpop.f32.mrf.mxu1  ;;  %v5071_v36 = vld [vmem:[#allocation7 + $0xf8] sm:$0xff] }
 0x181   :  { %3151 = vmatpush.bf16.msra.mxu2 %v5062_v43  ;;  %v2580_v41 = vadd.f32 %v5778_v34, %v2567_v35  ;;  %v2860_v34 = vpack.c.bf16 %v2856_v48, %v2856_v48  ;;  %3163 = vmatpush.bf16.msra.mxu3 %v5071_v36  ;;  %v5067_v43 = vld [vmem:[#allocation7 + $0xd8] sm:$0xff] }
 0x183   :  { %3126 = vmatpush.bf16.msra.mxu0 %v5045_v23  ;;  %v2593_v18 = vadd.f32 %v5780_v12, %v2580_v41  ;;  %v2606_v12 = vadd.f32 %v2605_v46, %v659_v52 }
 0x184   :  { %3139 = vmatpush.bf16.msra.mxu1 %v5053_v16 }
 0x185   :  { %3152 = vmatpush.bf16.msra.mxu2 %v5061_v22  ;;  %v2857_v25 = vmax.f32 %v2593_v18, 0.0  ;;  %v2619_v49 = vadd.f32 %v2618_v30, %v2606_v12  ;;  %3164 = vmatpush.bf16.msra.mxu3 %v5070_v2  ;;  %v5068_v30 = vld [vmem:[#allocation7 + $0xe0] sm:$0xff]  ;;  %v5065_v22 = vld [vmem:[#allocation7 + $0xc8] sm:$0xff] }
 0x187   :  { %3127 = vmatpush.bf16.msra.mxu0 %v5044_v3  ;;  %v2633_v45 = vpop.f32.mrf.mxu2  ;;  %v2861_v54 = vpack.c.bf16 %v2857_v25, %v2857_v25  ;;  %v2632_v50 = vadd.f32 %v2631_v6, %v2619_v49  ;;  %v5069_v3 = vld [vmem:[#allocation7 + $0xe8] sm:$0xff] }
 0x188   :  { %3140 = vmatpush.bf16.msra.mxu1 %v5052_v42  ;;  %v2646_v61 = vpop.f32.mrf.mxu3 }
 0x189   :  { %3153 = vmatpush.bf16.msra.mxu2 %v5060_v13  ;;  %v2645_v4 = vadd.f32 %v2644_v32, %v2632_v50  ;;  %3165 = vmatpush.bf16.msra.mxu3 %v5069_v3  ;;  %v5064_v13 = vld [vmem:[#allocation7 + $0xc0] sm:$0xff] }
 0x18b   :  { %3128 = vmatpush.bf16.msra.mxu0 %v5043_v11  ;;  %v5066_v11 = vld [vmem:[#allocation7 + $0xd0] sm:$0xff] }
 0x18c   :  { %3141 = vmatpush.bf16.msra.mxu1 %v5051_v5  ;;  %v660_v5 = vperm.slane %v5093_v51, 3 }
 0x18d   :  { %3154 = vmatpush.bf16.msra.mxu2 %v5059_v44  ;;  %3166 = vmatpush.bf16.msra.mxu3 %v5068_v30 }
 0x18f   :  { %3129 = vmatpush.bf16.msra.mxu0 %v5042_v38 }
 0x190   :  { %3142 = vmatpush.bf16.msra.mxu1 %v5050_v14 }
 0x191   :  { %3155 = vmatpush.bf16.msra.mxu2 %v5058_v47  ;;  %3167 = vmatpush.bf16.msra.mxu3 %v5067_v43 }
 0x193   :  { %3130 = vmatpush.bf16.msra.mxu0 %v5041_v9 }
 0x194   :  { %3143 = vmatpush.bf16.msra.mxu1 %v5049_v15 }
 0x195   :  { %3156 = vmatpush.bf16.msra.mxu2 %v5057_v31  ;;  %3168 = vmatpush.bf16.msra.mxu3 %v5066_v11  ;;  %v5091_v31 = vld [vmem:[#allocation8] ss:$0 sm:$0xff] }
 0x197   :  { %3131 = vmatpush.bf16.msra.mxu0 %v5040_v19  ;;  %v2657_v26 = vpop.f32.mrf.mxu0 }
 0x198   :  { %3144 = vmatpush.bf16.msra.mxu1 %v5048_v24  ;;  %v2670_v55 = vpop.f32.mrf.mxu1  ;;  %v2658_v59 = vadd.f32 %v2657_v26, %v2645_v4  ;;  %v5078_v4 = vld [vmem:[#allocation10 + $0x30] sm:$0xff] }
 0x199   :  { %3157 = vmatpush.bf16.msra.mxu2 %v5056_v56  ;;  %3169 = vmatpush.bf16.msra.mxu3 %v5065_v22 }
 0x19a   :  { %3132 = vmatmul.bf16.vlgmr.msra.gmra.mxu0 %v2860_v34  ;;  %v2671_v37 = vadd.f32 %v2670_v55, %v2658_v59  ;;  %v5075_v59 = vld [vmem:[#allocation10 + $0x18] sm:$0xff] }
 0x19b   :  { %3145 = vmatmul.bf16.vlgmr.msra.gmra.mxu1 %v2861_v54 }
 0x19d   :  { %3170 = vmatpush.bf16.msra.mxu3 %v5064_v13 }
 0x19f   :  { %v2683_v27 = vpop.f32.mrf.mxu2  ;;  %v2659_v17 = vpop.f32.mrf.mxu0 }
 0x1a0   :  { %v2696_v53 = vpop.f32.mrf.mxu3  ;;  %v2672_v58 = vpop.f32.mrf.mxu1  ;;  %v2684_v10 = vadd.f32 %v2683_v27, %v2671_v37  ;;  %v5074_v37 = vld [vmem:[#allocation10 + $0x10] sm:$0xff] }
 0x1a1   :  { %v5079_v58 = vld [vmem:[#allocation10 + $0x38] sm:$0xff] }
 0x1a2   :  { %v2697_v60 = vadd.f32 %v2696_v53, %v2684_v10  ;;  %3246 = vmatpush.bf16.msrb.mxu0 %v5079_v58 }
 0x1a6   :  { %3247 = vmatpush.bf16.msrb.mxu0 %v5078_v4 }
 0x1a7   :  { %v2685_v1 = vpop.f32.mrf.mxu2 }
 0x1a8   :  { %v2698_v39 = vpop.f32.mrf.mxu3  ;;  %v5077_v1 = vld [vmem:[#allocation10 + $0x28] sm:$0xff] }
 0x1a9   :  { %v5076_v39 = vld [vmem:[#allocation10 + $0x20] sm:$0xff] }
 0x1aa   :  { %3248 = vmatpush.bf16.msrb.mxu0 %v5077_v1 }
 0x1ae   :  { %3249 = vmatpush.bf16.msrb.mxu0 %v5076_v39 }
 0x1b2   :  { %3250 = vmatpush.bf16.msrb.mxu0 %v5075_v59 }
 0x1b6   :  { %3251 = vmatpush.bf16.msrb.mxu0 %v5074_v37 }
 0x1b7   :  { %v2709_v28 = vpop.f32.mrf.mxu0 }
 0x1b8   :  { %v2710_v33 = vadd.f32 %v2709_v28, %v2697_v60  ;;  %v2722_v62 = vpop.f32.mrf.mxu1 }
 0x1ba   :  { %v2723_v63 = vadd.f32 %v2722_v62, %v2710_v33  ;;  %v5073_v33 = vld [vmem:[#allocation10 + $0x8] sm:$0xff]  ;;  %v5072_v62 = vld [vmem:[#allocation10] sm:$0xff] }
 0x1bb   :  { %3252 = vmatpush.bf16.msrb.mxu0 %v5073_v33 }
 0x1bc   :  { %v2858_v20 = vmax.f32 %v2723_v63, 0.0 }
 0x1be   :  { %v2862_v21 = vpack.c.bf16 %v2858_v20, %v2858_v20 }
 0x1bf   :  { %v2735_v0 = vpop.f32.mrf.mxu2  ;;  %v2711_v23 = vpop.f32.mrf.mxu0  ;;  %3253 = vmatpush.bf16.msrb.mxu0 %v5072_v62 }
 0x1c0   :  { %v2748_v29 = vpop.f32.mrf.mxu3  ;;  %3158 = vmatmul.bf16.vlgmr.msra.gmra.mxu2 %v2862_v21  ;;  %v2724_v16 = vpop.f32.mrf.mxu1  ;;  %v2736_v35 = vadd.f32 %v2735_v0, %v660_v5 }
 0x1c2   :  { %v2749_v14 = vadd.f32 %v2748_v29, %v2736_v35  ;;  %v5092_v29 = vld [vmem:[#allocation11] ss:$0 sm:$0xff] }
 0x1c7   :  { %v2737_v46 = vpop.f32.mrf.mxu2 }
 0x1c8   :  { %v2750_v42 = vpop.f32.mrf.mxu3 }
 0x1d7   :  { %v2761_v57 = vpop.f32.mrf.mxu0 }
 0x1d8   :  { %v2774_v8 = vpop.f32.mrf.mxu1  ;;  %v2762_v9 = vadd.f32 %v2761_v57, %v2749_v14 }
 0x1da   :  { %v2775_v44 = vadd.f32 %v2774_v8, %v2762_v9 }
 0x1df   :  { %v2787_v6 = vpop.f32.mrf.mxu2  ;;  %v2763_v38 = vpop.f32.mrf.mxu0 }
 0x1e0   :  { %v2800_v32 = vpop.f32.mrf.mxu3  ;;  %v2776_v40 = vpop.f32.mrf.mxu1  ;;  %v2788_v15 = vadd.f32 %v2787_v6, %v2775_v44 }
 0x1e2   :  { %v2801_v45 = vadd.f32 %v2800_v32, %v2788_v15 }
 0x1e7   :  { %v2789_v7 = vpop.f32.mrf.mxu2 }
 0x1e8   :  { %v2802_v41 = vpop.f32.mrf.mxu3 }
 0x1f7   :  { %v2813_v18 = vpop.f32.mrf.mxu0 }
 0x1f8   :  { %v2826_v61 = vpop.f32.mrf.mxu1  ;;  %v2814_v19 = vadd.f32 %v2813_v18, %v2801_v45 }
 0x1fa   :  { %v2827_v47 = vadd.f32 %v2826_v61, %v2814_v19 }
 0x1ff   :  { %v2839_v48 = vpop.f32.mrf.mxu2  ;;  %v2815_v34 = vpop.f32.mrf.mxu0 }
 0x200   :  { %v2840_v24 = vadd.f32 %v2839_v48, %v2827_v47  ;;  %v2852_v25 = vpop.f32.mrf.mxu3  ;;  %v2828_v54 = vpop.f32.mrf.mxu1 }
 0x202   :  { %v2853_v51 = vadd.f32 %v2852_v25, %v2840_v24 }
 0x204   :  { %v2859_v52 = vmax.f32 %v2853_v51, 0.0 }
 0x206   :  { %v2863_v12 = vpack.c.bf16 %v2859_v52, %v2859_v52 }
 0x207   :  { %v2841_v26 = vpop.f32.mrf.mxu2 }
 0x208   :  { %v2854_v55 = vpop.f32.mrf.mxu3  ;;  %3171 = vmatmul.bf16.vlgmr.msra.gmra.mxu3 %v2863_v12 }
 0x217   :  { %v3133_v49 = vpop.f32.mrf.mxu0 }
 0x218   :  { %v3134_v27 = vadd.f32 %v5091_v31, %v3133_v49  ;;  %v3146_v56 = vpop.f32.mrf.mxu1 }
 0x21a   :  { %v3147_v53 = vadd.f32 %v3146_v56, %v3134_v27 }
 0x21f   :  { %v3135_v50 = vpop.f32.mrf.mxu0 }
 0x220   :  { %v3148_v17 = vpop.f32.mrf.mxu1 }
 0x243   :  { %v3159_v10 = vpop.f32.mrf.mxu2 }
 0x244   :  { %v3160_v60 = vadd.f32 %v3159_v10, %v3147_v53 }
 0x24b   :  { %v3161_v28 = vpop.f32.mrf.mxu2 }
 0x28b   :  { %v3172_v63 = vpop.f32.mrf.mxu3 }
 0x28c   :  { %v3173_v20 = vadd.f32 %v3172_v63, %v3160_v60 }
 0x28e   :  { %v3176_v21 = vmax.f32 %v3173_v20, 0.0 }
 0x290   :  { %v3177_v0 = vpack.c.bf16 %v3176_v21, %v3176_v21 }
 0x292   :  { %3254 = vmatmul.bf16.vlgmr.msrb.gmra.mxu0 %v3177_v0 }
 0x293   :  { %v3174_v36 = vpop.f32.mrf.mxu3 }
 0x30f   :  { %v3255_v23 = vpop.f32.mrf.mxu0 }
 0x310   :  { %v3256_v16 = vadd.f32 %v5092_v29, %v3255_v23 }
 0x312   :  { %3259 = vst [vmem:[#allocation13] sm:$0x3] %v3256_v16 }
 0x313   :  { %3270 = dma.vmem_to_hbm [thread:$0]  %s3266_s25, 32, %s3268_s3, [#allocation4]  }
 0x317   :  { %v3257_v2 = vpop.f32.mrf.mxu0 }
 0x318   :  { %5270 = dma.done.wait [#allocation4], 32  }
 0x319   :  { %5271 = vsyncadd [#allocation4], 4294967264 }
 0x31a   :  { %3275 = vsyncpa [#allocation3], 1 }
 0x31b   :  { %3276 = vsyncpa [#allocation6], 1 }
 0x31c   :  { %3277 = vsyncpa [#allocation9], 1 }
 0x31d   :  { %3278 = vsyncpa [#allocation12], 1 }
 0x31e   :  { %3279 = vsyncpa [#allocation4], 1 }

</bundles_post_ra>
